<compile_context>
chip_gen: v7x
topology: tpu7x:2x2x1
jax: 0.10.0
libtpu: 0.0.40
codegen_flags: <defaults>
</compile_context>

<pallas_src>
import functools

import jax
import jax.numpy as jnp
from jax.experimental import pallas as pl
from jax.experimental.pallas import tpu as pltpu

IMG = 28 * 28      # 784
IMG_PAD = 896      # 7 * 128  (lane-dense padding of the 784-dim image axis)


def _round_up(x, m):
    return (x + m - 1) // m * m


def _z_pad(z_dim):
    # width of the fused [mu | log_var] head / eps / z axis: lane-dense (>=128)
    return _round_up(max(2 * z_dim, 128), 128)


# ----------------------------------------------------------------------------
# Fused kernel builder
# ----------------------------------------------------------------------------
def _make_fused_vae_kernel(n_enc_hidden, n_dec_hidden, z_dim, z_pad, mxu_dtype):
    """Kernel for a fixed number of encoder/decoder hidden layers."""

    def dense(h, w_ref, b_ref, act):
        # MXU matmul in mxu_dtype (weights pre-cast in wrapper) with f32 accumulation;
        # bias add + activation in f32 (v5e has no bf16 VPU/EUP).
        y = jnp.dot(h.astype(mxu_dtype), w_ref[...],
                    preferred_element_type=jnp.float32)
        y = y + b_ref[...]                  # single (1, N) broadcast per layer
        if act == "relu":
            y = jnp.maximum(y, 0.0)
        elif act == "leaky_relu":           # torch default negative_slope = 0.01
            y = jnp.where(y >= 0.0, y, 0.01 * y)
        elif act == "sigmoid":
            y = jax.nn.sigmoid(y)
        elif act != "none":
            raise ValueError(f"unknown act {act}")
        return y

    def kernel(*refs):
        it = iter(refs)
        x_ref = next(it)                    # (tile_b, IMG_PAD) mxu_dtype
        eps_ref = next(it)                  # (tile_b, z_pad)   f32

        def take_layer():
            return next(it), next(it)       # (w_ref, b_ref)

        enc_in = take_layer()
        enc_hidden = [take_layer() for _ in range(n_enc_hidden)]
        head_lin = take_layer()             # fused [mu | var] head
        dec1 = take_layer()
        dec_hidden = [take_layer() for _ in range(n_dec_hidden)]
        dec_out = take_layer()

        out_ref = next(it)                  # (tile_b, IMG_PAD) f32
        head_ref = next(it)                 # (tile_b, z_pad)   f32  [mu | log_var | 0]

        # ---- encoder ----
        h = dense(x_ref[...], *enc_in, act="relu")
        for w_r, b_r in enc_hidden:
            h = dense(h, w_r, b_r, act="leaky_relu")

        # ---- fused mu/var head (reference applies ReLU to both) ----
        head = dense(h, *head_lin, act="relu")          # (tile_b, z_pad)
        head_ref[...] = head.astype(head_ref.dtype)     # one lane-dense store

        # ---- reparameterize (fused; exp -> EUP slot) ----
        # bring log_var (lanes z_dim..2*z_dim-1) onto the mu lanes (0..z_dim-1);
        # XLU rotate, essentially free.
        lv_aligned = pltpu.roll(head, z_pad - z_dim, 1)
        z = eps_ref[...] * jnp.exp(0.5 * lv_aligned) + head
        # lanes >= z_dim of z hold finite junk; dec1's padded weight rows are zero,
        # so they contribute nothing to the decoder matmul.

        # ---- decoder ----
        d = dense(z, *dec1, act="relu")
        for w_r, b_r in dec_hidden:
            d = dense(d, w_r, b_r, act="relu")
        out = dense(d, *dec_out, act="sigmoid")
        out_ref[...] = out.astype(out_ref.dtype)

    return kernel


# ----------------------------------------------------------------------------
# Parameter init (deterministic, PyTorch-Linear-style uniform bounds)
# ----------------------------------------------------------------------------
def init_linear(key, in_dim, out_dim):
    kw, kb = jax.random.split(key)
    bound = 1.0 / jnp.sqrt(jnp.float32(in_dim))
    # stored as (in, out) so the kernel computes x @ W directly
    w = jax.random.uniform(kw, (in_dim, out_dim), jnp.float32, -bound, bound)
    b = jax.random.uniform(kb, (out_dim,), jnp.float32, -bound, bound)
    return w, b


def init_mlp_vae_params(key, z_dim, encoder_list, decoder_list):
    keys = jax.random.split(key, 4 + len(encoder_list) + len(decoder_list) + 8)
    ki = iter(keys)
    params = {}
    params["enc_input"] = init_linear(next(ki), IMG, encoder_list[0])
    params["enc_hidden"] = [
        init_linear(next(ki), encoder_list[i], encoder_list[i + 1])
        for i in range(len(encoder_list) - 1)
    ]
    params["mu"] = init_linear(next(ki), encoder_list[-1], z_dim)
    params["var"] = init_linear(next(ki), encoder_list[-1], z_dim)
    params["dec_linear1"] = init_linear(next(ki), z_dim, decoder_list[0])
    params["dec_hidden"] = [
        init_linear(next(ki), decoder_list[i], decoder_list[i + 1])
        for i in range(len(decoder_list) - 1)
    ]
    params["dec_output"] = init_linear(next(ki), decoder_list[-1], IMG)
    return params


# ----------------------------------------------------------------------------
# One-time weight packing (hoisted out of the per-call forward)
# ----------------------------------------------------------------------------
def pack_mlp_vae_params(params, z_dim, mxu_dtype=jnp.bfloat16):
    z_pad = _z_pad(z_dim)

    def prep(w, b, pad_in=0, pad_out=0):
        if pad_in:
            w = jnp.pad(w, ((0, pad_in), (0, 0)))
        if pad_out:
            w = jnp.pad(w, ((0, 0), (0, pad_out)))
            b = jnp.pad(b, (0, pad_out))
        return [jnp.asarray(w, mxu_dtype),
                jnp.asarray(b, jnp.float32).reshape(1, -1)]

    flat = []
    flat += prep(*params["enc_input"], pad_in=IMG_PAD - IMG)
    for w, b in params["enc_hidden"]:
        flat += prep(w, b)
    # fused [mu | var] head, padded to z_pad lanes (zero cols / bias -> head[:,2z:]=0)
    w_mu, b_mu = params["mu"]
    w_var, b_var = params["var"]
    w_head = jnp.concatenate([w_mu, w_var], axis=1)
    b_head = jnp.concatenate([b_mu, b_var], axis=0)
    flat += prep(w_head, b_head, pad_out=z_pad - 2 * z_dim)
    # dec_linear1 with K padded to z_pad (zero rows -> padded z lanes contribute 0)
    flat += prep(*params["dec_linear1"], pad_in=z_pad - z_dim)
    for w, b in params["dec_hidden"]:
        flat += prep(w, b)
    flat += prep(*params["dec_output"], pad_out=IMG_PAD - IMG)
    return flat


# ----------------------------------------------------------------------------
# Fused forward pass (single pallas_call) — matches MLP_VAE.forward semantics
# ----------------------------------------------------------------------------
def mlp_vae_forward(flat, x, eps, *, n_enc_hidden, n_dec_hidden, z_dim,
                    mxu_dtype=jnp.bfloat16):
    B = x.shape[0]
    z_pad = _z_pad(z_dim)

    # Batch tiling: multiples of 16 (bf16 sublane packing); for B > 16 make at
    # least 2 grid steps so the "parallel" axis shards across both v7x TCs; cap
    # at 256 to amortize per-step overhead (VMEM is nowhere near a constraint).
    B16 = _round_up(B, 16)
    if B16 <= 16:
        tile_b = B16
    else:
        tile_b = min(_round_up((B16 + 1) // 2, 16), 256)
    Bp = _round_up(B16, tile_b)

    # Input cast to bf16 + lane-dense padding (zeros -> no effect on matmuls);
    # halves the largest HBM->VMEM DMA.
    x_flat = x.reshape(B, -1)
    x_pad = jnp.zeros((Bp, IMG_PAD), mxu_dtype).at[:B, :IMG].set(
        x_flat.astype(mxu_dtype))
    eps_pad = jnp.zeros((Bp, z_pad), jnp.float32).at[:B, :z_dim].set(
        eps.astype(jnp.float32))

    # Weights/biases: full-array blocks, constant index_map -> resident in VMEM.
    w_specs = [pl.BlockSpec(a.shape, lambda i: (0, 0)) for a in flat]

    kernel = _make_fused_vae_kernel(n_enc_hidden, n_dec_hidden, z_dim, z_pad,
                                    mxu_dtype)

    out, head = pl.pallas_call(
        kernel,
        out_shape=(
            jax.ShapeDtypeStruct((Bp, IMG_PAD), jnp.float32),
            jax.ShapeDtypeStruct((Bp, z_pad), jnp.float32),
        ),
        grid=(Bp // tile_b,),
        in_specs=[
            pl.BlockSpec((tile_b, IMG_PAD), lambda i: (i, 0)),
            pl.BlockSpec((tile_b, z_pad), lambda i: (i, 0)),
            *w_specs,
        ],
        out_specs=(
            pl.BlockSpec((tile_b, IMG_PAD), lambda i: (i, 0)),
            pl.BlockSpec((tile_b, z_pad), lambda i: (i, 0)),
        ),
        compiler_params=pltpu.CompilerParams(
            dimension_semantics=("parallel",)),
    )(x_pad, eps_pad, *flat)

    out = out[:B, :IMG].reshape(-1, 1, 28, 28)              # out.view(-1,1,28,28)
    mu = head[:B, :z_dim]
    log_var = head[:B, z_dim:2 * z_dim]
    return out, mu, log_var


# ----------------------------------------------------------------------------
# Pure-JAX reference (f32) for correctness checking
# ----------------------------------------------------------------------------
def mlp_vae_reference(params, x, eps):
    B = x.shape[0]
    h = x.reshape(B, -1).astype(jnp.float32)
    w, b = params["enc_input"]
    h = jax.nn.relu(h @ w + b)
    for w, b in params["enc_hidden"]:
        h = jax.nn.leaky_relu(h @ w + b, negative_slope=0.01)
    w, b = params["mu"]
    mu = jax.nn.relu(h @ w + b)
    w, b = params["var"]
    log_var = jax.nn.relu(h @ w + b)
    z = eps * jnp.exp(0.5 * log_var) + mu
    w, b = params["dec_linear1"]
    d = jax.nn.relu(z @ w + b)
    for w, b in params["dec_hidden"]:
        d = jax.nn.relu(d @ w + b)
    w, b = params["dec_output"]
    out = jax.nn.sigmoid(d @ w + b)
    return out.reshape(-1, 1, 28, 28), mu, log_var


# ----------------------------------------------------------------------------
# Main
# ----------------------------------------------------------------------------
if __name__ == "__main__":
    B = 2
    z_dim = 32
    encoder_list = [256, 128]
    decoder_list = [128, 256]

    key = jax.random.PRNGKey(0)
    k_param, k_x, k_eps = jax.random.split(key, 3)

    params = init_mlp_vae_params(k_param, z_dim, encoder_list, decoder_list)

    # input image batch, NCHW like the PyTorch module expects
    x = jax.random.uniform(k_x, (B, 1, 28, 28), jnp.float32)
    # eps corresponds to torch.randn_like(std) — drawn deterministically here
    eps = jax.random.normal(k_eps, (B, z_dim), jnp.float32)

    # one-time weight prep (pad + bf16 cast), hoisted out of the forward pass
    flat = jax.block_until_ready(pack_mlp_vae_params(params, z_dim))

    fwd = jax.jit(functools.partial(
        mlp_vae_forward,
        n_enc_hidden=len(encoder_list) - 1,
        n_dec_hidden=len(decoder_list) - 1,
        z_dim=z_dim))

    out, mu, log_var = fwd(flat, x, eps)
    jax.block_until_ready((out, mu, log_var))

    assert out.shape == (B, 1, 28, 28)
    assert mu.shape == (B, z_dim)
    assert log_var.shape == (B, z_dim)
    assert bool(jnp.all(jnp.isfinite(out)))
    assert bool(jnp.all((out >= 0.0) & (out <= 1.0)))  # sigmoid output range

    # Correctness vs pure-JAX f32 reference (loose tol: bf16 MXU inputs).
    out_ref, mu_ref, lv_ref = mlp_vae_reference(params, x, eps)
    assert bool(jnp.allclose(out, out_ref, atol=3e-2, rtol=3e-2))
    assert bool(jnp.allclose(mu, mu_ref, atol=3e-2, rtol=3e-2))
    assert bool(jnp.allclose(log_var, lv_ref, atol=3e-2, rtol=3e-2))

    print("KERNEL_OK")
</pallas_src>

<mosaic_0001>
module attributes {stable_mosaic.version = 11 : i64} {
  func.func @kernel(%arg0: i32, %arg1: memref<16x896xbf16, #tpu.memory_space<vmem>>, %arg2: memref<16x128xf32, #tpu.memory_space<vmem>>, %arg3: memref<896x256xbf16, #tpu.memory_space<vmem>>, %arg4: memref<1x256xf32, #tpu.memory_space<vmem>>, %arg5: memref<256x128xbf16, #tpu.memory_space<vmem>>, %arg6: memref<1x128xf32, #tpu.memory_space<vmem>>, %arg7: memref<128x128xbf16, #tpu.memory_space<vmem>>, %arg8: memref<1x128xf32, #tpu.memory_space<vmem>>, %arg9: memref<128x128xbf16, #tpu.memory_space<vmem>>, %arg10: memref<1x128xf32, #tpu.memory_space<vmem>>, %arg11: memref<128x256xbf16, #tpu.memory_space<vmem>>, %arg12: memref<1x256xf32, #tpu.memory_space<vmem>>, %arg13: memref<256x896xbf16, #tpu.memory_space<vmem>>, %arg14: memref<1x896xf32, #tpu.memory_space<vmem>>, %arg15: memref<16x896xf32, #tpu.memory_space<vmem>>, %arg16: memref<16x128xf32, #tpu.memory_space<vmem>>) attributes {dimension_semantics = [#tpu.dimension_semantics<parallel>], iteration_bounds = array<i64: 1>, scalar_prefetch = 0 : i64, scratch_operands = 0 : i64, tpu.core_type = #tpu.core_type<tc>, window_params = [{transform_indices = @transform_0, window_bounds = array<i64: 16, 896>}, {transform_indices = @transform_1, window_bounds = array<i64: 16, 128>}, {pipeline_mode = #tpu.pipeline_mode<synchronous>, transform_indices = @transform_2, window_bounds = array<i64: 896, 256>}, {pipeline_mode = #tpu.pipeline_mode<synchronous>, transform_indices = @transform_3, window_bounds = array<i64: 1, 256>}, {pipeline_mode = #tpu.pipeline_mode<synchronous>, transform_indices = @transform_4, window_bounds = array<i64: 256, 128>}, {pipeline_mode = #tpu.pipeline_mode<synchronous>, transform_indices = @transform_5, window_bounds = array<i64: 1, 128>}, {pipeline_mode = #tpu.pipeline_mode<synchronous>, transform_indices = @transform_6, window_bounds = array<i64: 128, 128>}, {pipeline_mode = #tpu.pipeline_mode<synchronous>, transform_indices = @transform_7, window_bounds = array<i64: 1, 128>}, {pipeline_mode = #tpu.pipeline_mode<synchronous>, transform_indices = @transform_8, window_bounds = array<i64: 128, 128>}, {pipeline_mode = #tpu.pipeline_mode<synchronous>, transform_indices = @transform_9, window_bounds = array<i64: 1, 128>}, {pipeline_mode = #tpu.pipeline_mode<synchronous>, transform_indices = @transform_10, window_bounds = array<i64: 128, 256>}, {pipeline_mode = #tpu.pipeline_mode<synchronous>, transform_indices = @transform_11, window_bounds = array<i64: 1, 256>}, {pipeline_mode = #tpu.pipeline_mode<synchronous>, transform_indices = @transform_12, window_bounds = array<i64: 256, 896>}, {pipeline_mode = #tpu.pipeline_mode<synchronous>, transform_indices = @transform_13, window_bounds = array<i64: 1, 896>}, {transform_indices = @transform_14, window_bounds = array<i64: 16, 896>}, {transform_indices = @transform_15, window_bounds = array<i64: 16, 128>}]} {
    %c0 = arith.constant 0 : index
    %c0_0 = arith.constant 0 : index
    %0 = vector.load %arg1[%c0, %c0_0] : memref<16x896xbf16, #tpu.memory_space<vmem>>, vector<16x896xbf16>
    %c0_1 = arith.constant 0 : index
    %c0_2 = arith.constant 0 : index
    %1 = vector.load %arg3[%c0_1, %c0_2] : memref<896x256xbf16, #tpu.memory_space<vmem>>, vector<896x256xbf16>
    %cst = arith.constant dense<0.000000e+00> : vector<16x256xf32>
    %2 = tpu.matmul %0, %1, %cst {dimension_numbers = #tpu.dot_dimension_numbers<[1], [0], [0], [1], [0, 0, 1, 1], [], []>} : vector<16x896xbf16>, vector<896x256xbf16>, vector<16x256xf32> -> vector<16x256xf32>
    %c0_3 = arith.constant 0 : index
    %c0_4 = arith.constant 0 : index
    %3 = vector.load %arg4[%c0_3, %c0_4] : memref<1x256xf32, #tpu.memory_space<vmem>>, vector<1x256xf32>
    %4 = vector.broadcast %3 : vector<1x256xf32> to vector<16x256xf32>
    %5 = arith.addf %2, %4 : vector<16x256xf32>
    %cst_5 = arith.constant 0.000000e+00 : f32
    %6 = vector.broadcast %cst_5 : f32 to vector<16x256xf32>
    %7 = arith.maximumf %5, %6 : vector<16x256xf32>
    %8 = arith.truncf %7 : vector<16x256xf32> to vector<16x256xbf16>
    %c0_6 = arith.constant 0 : index
    %c0_7 = arith.constant 0 : index
    %9 = vector.load %arg5[%c0_6, %c0_7] : memref<256x128xbf16, #tpu.memory_space<vmem>>, vector<256x128xbf16>
    %cst_8 = arith.constant dense<0.000000e+00> : vector<16x128xf32>
    %10 = tpu.matmul %8, %9, %cst_8 {dimension_numbers = #tpu.dot_dimension_numbers<[1], [0], [0], [1], [0, 0, 1, 1], [], []>} : vector<16x256xbf16>, vector<256x128xbf16>, vector<16x128xf32> -> vector<16x128xf32>
    %c0_9 = arith.constant 0 : index
    %c0_10 = arith.constant 0 : index
    %11 = vector.load %arg6[%c0_9, %c0_10] : memref<1x128xf32, #tpu.memory_space<vmem>>, vector<1x128xf32>
    %12 = vector.broadcast %11 : vector<1x128xf32> to vector<16x128xf32>
    %13 = arith.addf %10, %12 : vector<16x128xf32>
    %cst_11 = arith.constant 0.000000e+00 : f32
    %14 = vector.broadcast %cst_11 : f32 to vector<16x128xf32>
    %15 = arith.cmpf oge, %13, %14 : vector<16x128xf32>
    %cst_12 = arith.constant 0.00999999977 : f32
    %16 = vector.broadcast %cst_12 : f32 to vector<16x128xf32>
    %17 = arith.mulf %16, %13 : vector<16x128xf32>
    %18 = arith.select %15, %13, %17 : vector<16x128xi1>, vector<16x128xf32>
    %19 = arith.truncf %18 : vector<16x128xf32> to vector<16x128xbf16>
    %c0_13 = arith.constant 0 : index
    %c0_14 = arith.constant 0 : index
    %20 = vector.load %arg7[%c0_13, %c0_14] : memref<128x128xbf16, #tpu.memory_space<vmem>>, vector<128x128xbf16>
    %cst_15 = arith.constant dense<0.000000e+00> : vector<16x128xf32>
    %21 = tpu.matmul %19, %20, %cst_15 {dimension_numbers = #tpu.dot_dimension_numbers<[1], [0], [0], [1], [0, 0, 1, 1], [], []>} : vector<16x128xbf16>, vector<128x128xbf16>, vector<16x128xf32> -> vector<16x128xf32>
    %c0_16 = arith.constant 0 : index
    %c0_17 = arith.constant 0 : index
    %22 = vector.load %arg8[%c0_16, %c0_17] : memref<1x128xf32, #tpu.memory_space<vmem>>, vector<1x128xf32>
    %23 = vector.broadcast %22 : vector<1x128xf32> to vector<16x128xf32>
    %24 = arith.addf %21, %23 : vector<16x128xf32>
    %cst_18 = arith.constant 0.000000e+00 : f32
    %25 = vector.broadcast %cst_18 : f32 to vector<16x128xf32>
    %26 = arith.maximumf %24, %25 : vector<16x128xf32>
    %c0_19 = arith.constant 0 : index
    %c0_20 = arith.constant 0 : index
    %27 = vector.load %arg16[%c0_19, %c0_20] : memref<16x128xf32, #tpu.memory_space<vmem>>, vector<16x128xf32>
    tpu.vector_store %arg16[%c0_19, %c0_20], %26 {strides = array<i32>} : memref<16x128xf32, #tpu.memory_space<vmem>>, vector<16x128xf32>,
    %c96_i32 = arith.constant 96 : i32
    %28 = tpu.dynamic_rotate %26 by %c96_i32 dim 1 : vector<16x128xf32>, i32 -> vector<16x128xf32>
    %c0_21 = arith.constant 0 : index
    %c0_22 = arith.constant 0 : index
    %29 = vector.load %arg2[%c0_21, %c0_22] : memref<16x128xf32, #tpu.memory_space<vmem>>, vector<16x128xf32>
    %cst_23 = arith.constant 5.000000e-01 : f32
    %30 = vector.broadcast %cst_23 : f32 to vector<16x128xf32>
    %31 = arith.mulf %30, %28 : vector<16x128xf32>
    %32 = math.exp %31 : vector<16x128xf32>
    %33 = arith.mulf %29, %32 : vector<16x128xf32>
    %34 = arith.addf %33, %26 : vector<16x128xf32>
    %35 = arith.truncf %34 : vector<16x128xf32> to vector<16x128xbf16>
    %c0_24 = arith.constant 0 : index
    %c0_25 = arith.constant 0 : index
    %36 = vector.load %arg9[%c0_24, %c0_25] : memref<128x128xbf16, #tpu.memory_space<vmem>>, vector<128x128xbf16>
    %cst_26 = arith.constant dense<0.000000e+00> : vector<16x128xf32>
    %37 = tpu.matmul %35, %36, %cst_26 {dimension_numbers = #tpu.dot_dimension_numbers<[1], [0], [0], [1], [0, 0, 1, 1], [], []>} : vector<16x128xbf16>, vector<128x128xbf16>, vector<16x128xf32> -> vector<16x128xf32>
    %c0_27 = arith.constant 0 : index
    %c0_28 = arith.constant 0 : index
    %38 = vector.load %arg10[%c0_27, %c0_28] : memref<1x128xf32, #tpu.memory_space<vmem>>, vector<1x128xf32>
    %39 = vector.broadcast %38 : vector<1x128xf32> to vector<16x128xf32>
    %40 = arith.addf %37, %39 : vector<16x128xf32>
    %cst_29 = arith.constant 0.000000e+00 : f32
    %41 = vector.broadcast %cst_29 : f32 to vector<16x128xf32>
    %42 = arith.maximumf %40, %41 : vector<16x128xf32>
    %43 = arith.truncf %42 : vector<16x128xf32> to vector<16x128xbf16>
    %c0_30 = arith.constant 0 : index
    %c0_31 = arith.constant 0 : index
    %44 = vector.load %arg11[%c0_30, %c0_31] : memref<128x256xbf16, #tpu.memory_space<vmem>>, vector<128x256xbf16>
    %cst_32 = arith.constant dense<0.000000e+00> : vector<16x256xf32>
    %45 = tpu.matmul %43, %44, %cst_32 {dimension_numbers = #tpu.dot_dimension_numbers<[1], [0], [0], [1], [0, 0, 1, 1], [], []>} : vector<16x128xbf16>, vector<128x256xbf16>, vector<16x256xf32> -> vector<16x256xf32>
    %c0_33 = arith.constant 0 : index
    %c0_34 = arith.constant 0 : index
    %46 = vector.load %arg12[%c0_33, %c0_34] : memref<1x256xf32, #tpu.memory_space<vmem>>, vector<1x256xf32>
    %47 = vector.broadcast %46 : vector<1x256xf32> to vector<16x256xf32>
    %48 = arith.addf %45, %47 : vector<16x256xf32>
    %cst_35 = arith.constant 0.000000e+00 : f32
    %49 = vector.broadcast %cst_35 : f32 to vector<16x256xf32>
    %50 = arith.maximumf %48, %49 : vector<16x256xf32>
    %51 = arith.truncf %50 : vector<16x256xf32> to vector<16x256xbf16>
    %c0_36 = arith.constant 0 : index
    %c0_37 = arith.constant 0 : index
    %52 = vector.load %arg13[%c0_36, %c0_37] : memref<256x896xbf16, #tpu.memory_space<vmem>>, vector<256x896xbf16>
    %cst_38 = arith.constant dense<0.000000e+00> : vector<16x896xf32>
    %53 = tpu.matmul %51, %52, %cst_38 {dimension_numbers = #tpu.dot_dimension_numbers<[1], [0], [0], [1], [0, 0, 1, 1], [], []>} : vector<16x256xbf16>, vector<256x896xbf16>, vector<16x896xf32> -> vector<16x896xf32>
    %c0_39 = arith.constant 0 : index
    %c0_40 = arith.constant 0 : index
    %54 = vector.load %arg14[%c0_39, %c0_40] : memref<1x896xf32, #tpu.memory_space<vmem>>, vector<1x896xf32>
    %55 = vector.broadcast %54 : vector<1x896xf32> to vector<16x896xf32>
    %56 = arith.addf %53, %55 : vector<16x896xf32>
    %57 = arith.negf %56 : vector<16x896xf32>
    %58 = math.exp %57 : vector<16x896xf32>
    %cst_41 = arith.constant 1.000000e+00 : f32
    %59 = vector.broadcast %cst_41 : f32 to vector<16x896xf32>
    %60 = arith.addf %59, %58 : vector<16x896xf32>
    %61 = arith.divf %59, %60 : vector<16x896xf32>
    %c0_42 = arith.constant 0 : index
    %c0_43 = arith.constant 0 : index
    %62 = vector.load %arg15[%c0_42, %c0_43] : memref<16x896xf32, #tpu.memory_space<vmem>>, vector<16x896xf32>
    tpu.vector_store %arg15[%c0_42, %c0_43], %61 {strides = array<i32>} : memref<16x896xf32, #tpu.memory_space<vmem>>, vector<16x896xf32>,
    return
  }
  func.func @transform_0(%arg0: i32) -> (i32, i32) {
    %c0_i32 = arith.constant 0 : i32
    %c0_i32_0 = arith.constant 0 : i32
    return %arg0, %c0_i32 : i32, i32
  }
  func.func @transform_1(%arg0: i32) -> (i32, i32) {
    %c0_i32 = arith.constant 0 : i32
    %c0_i32_0 = arith.constant 0 : i32
    return %arg0, %c0_i32 : i32, i32
  }
  func.func @transform_2(%arg0: i32) -> (i32, i32) {
    %c0_i32 = arith.constant 0 : i32
    %c0_i32_0 = arith.constant 0 : i32
    %c0_i32_1 = arith.constant 0 : i32
    return %c0_i32, %c0_i32_0 : i32, i32
  }
  func.func @transform_3(%arg0: i32) -> (i32, i32) {
    %c0_i32 = arith.constant 0 : i32
    %c0_i32_0 = arith.constant 0 : i32
    %c0_i32_1 = arith.constant 0 : i32
    return %c0_i32, %c0_i32_0 : i32, i32
  }
  func.func @transform_4(%arg0: i32) -> (i32, i32) {
    %c0_i32 = arith.constant 0 : i32
    %c0_i32_0 = arith.constant 0 : i32
    %c0_i32_1 = arith.constant 0 : i32
    return %c0_i32, %c0_i32_0 : i32, i32
  }
  func.func @transform_5(%arg0: i32) -> (i32, i32) {
    %c0_i32 = arith.constant 0 : i32
    %c0_i32_0 = arith.constant 0 : i32
    %c0_i32_1 = arith.constant 0 : i32
    return %c0_i32, %c0_i32_0 : i32, i32
  }
  func.func @transform_6(%arg0: i32) -> (i32, i32) {
    %c0_i32 = arith.constant 0 : i32
    %c0_i32_0 = arith.constant 0 : i32
    %c0_i32_1 = arith.constant 0 : i32
    return %c0_i32, %c0_i32_0 : i32, i32
  }
  func.func @transform_7(%arg0: i32) -> (i32, i32) {
    %c0_i32 = arith.constant 0 : i32
    %c0_i32_0 = arith.constant 0 : i32
    %c0_i32_1 = arith.constant 0 : i32
    return %c0_i32, %c0_i32_0 : i32, i32
  }
  func.func @transform_8(%arg0: i32) -> (i32, i32) {
    %c0_i32 = arith.constant 0 : i32
    %c0_i32_0 = arith.constant 0 : i32
    %c0_i32_1 = arith.constant 0 : i32
    return %c0_i32, %c0_i32_0 : i32, i32
  }
  func.func @transform_9(%arg0: i32) -> (i32, i32) {
    %c0_i32 = arith.constant 0 : i32
    %c0_i32_0 = arith.constant 0 : i32
    %c0_i32_1 = arith.constant 0 : i32
    return %c0_i32, %c0_i32_0 : i32, i32
  }
  func.func @transform_10(%arg0: i32) -> (i32, i32) {
    %c0_i32 = arith.constant 0 : i32
    %c0_i32_0 = arith.constant 0 : i32
    %c0_i32_1 = arith.constant 0 : i32
    return %c0_i32, %c0_i32_0 : i32, i32
  }
  func.func @transform_11(%arg0: i32) -> (i32, i32) {
    %c0_i32 = arith.constant 0 : i32
    %c0_i32_0 = arith.constant 0 : i32
    %c0_i32_1 = arith.constant 0 : i32
    return %c0_i32, %c0_i32_0 : i32, i32
  }
  func.func @transform_12(%arg0: i32) -> (i32, i32) {
    %c0_i32 = arith.constant 0 : i32
    %c0_i32_0 = arith.constant 0 : i32
    %c0_i32_1 = arith.constant 0 : i32
    return %c0_i32, %c0_i32_0 : i32, i32
  }
  func.func @transform_13(%arg0: i32) -> (i32, i32) {
    %c0_i32 = arith.constant 0 : i32
    %c0_i32_0 = arith.constant 0 : i32
    %c0_i32_1 = arith.constant 0 : i32
    return %c0_i32, %c0_i32_0 : i32, i32
  }
  func.func @transform_14(%arg0: i32) -> (i32, i32) {
    %c0_i32 = arith.constant 0 : i32
    %c0_i32_0 = arith.constant 0 : i32
    return %arg0, %c0_i32 : i32, i32
  }
  func.func @transform_15(%arg0: i32) -> (i32, i32) {
    %c0_i32 = arith.constant 0 : i32
    %c0_i32_0 = arith.constant 0 : i32
    return %arg0, %c0_i32 : i32, i32
  }
}

</mosaic_0001>

<bundles_post_ra>
// kernel: mlp_vae_forward.1
= control target key start
LH: loop header
LB: loop body
LE: loop exit
PB: predicated region body
PF: predicated region fallthrough
CT: control target
= control target key end

     0   :  { %21 = vsyncpa [#allocation3], 0  ;;  %s4198_s0 = inlined_call_operand.vmem [shape: bf16[16,896], index: 0, kind: input, shape index: {}]   ;;  %s4199_s1 = inlined_call_operand.vmem [shape: f32[16,128], index: 1, kind: input, shape index: {}]   ;;  %s4200_s2 = inlined_call_operand.hbm [shape: bf16[896,256], index: 2, kind: input, shape index: {}]   ;;  %s4201_s3 = inlined_call_operand.hbm [shape: f32[1,256], index: 3, kind: input, shape index: {}]   ;;  %s4202_s4 = inlined_call_operand.vmem [shape: bf16[256,128], index: 4, kind: input, shape index: {}]   ;;  %s4203_s5 = inlined_call_operand.hbm [shape: f32[1,128], index: 5, kind: input, shape index: {}]   ;;  %s4204_s6 = inlined_call_operand.vmem [shape: bf16[128,128], index: 6, kind: input, shape index: {}]   ;;  %s4205_s7 = inlined_call_operand.hbm [shape: f32[1,128], index: 7, kind: input, shape index: {}]   ;;  %s4206_s8 = inlined_call_operand.hbm [shape: bf16[128,128], index: 8, kind: input, shape index: {}]   ;;  %s4207_s9 = inlined_call_operand.hbm [shape: f32[1,128], index: 9, kind: input, shape index: {}]   ;;  %s4208_s10 = inlined_call_operand.hbm [shape: bf16[128,256], index: 10, kind: input, shape index: {}]   ;;  %s4209_s11 = inlined_call_operand.hbm [shape: f32[1,256], index: 11, kind: input, shape index: {}]   ;;  %s4210_s12 = inlined_call_operand.hbm [shape: bf16[256,896], index: 12, kind: input, shape index: {}]   ;;  %s4211_s13 = inlined_call_operand.vmem [shape: f32[1,896], index: 13, kind: input, shape index: {}]   ;;  %s4212_s14 = inlined_call_operand.vmem [shape: f32[16,896], index: 14, kind: output, shape index: {0}]   ;;  %s4213_s15 = inlined_call_operand.vmem [shape: f32[16,128], index: 15, kind: output, shape index: {1}]  }
   0x1   :  { %22 = vsyncpa [#allocation5], 0 }
   0x2   :  { %23 = vsyncpa [#allocation8], 0 }
   0x3   :  { %24 = vsyncpa [#allocation11], 0 }
   0x4   :  { %25 = vsyncpa [#allocation14], 0  ;;  %s3773_s18 = smov [#allocation4]   ;;  %s3774_s20 = smov [#allocation7]  }
   0x5   :  { %s48_s19 = sshll.u32 %s3773_s18, 4  ;;  %s72_s21 = sshll.u32 %s3774_s20, 4  ;;  %s49_s19 = int_to_ptr.vmem [resolvable:$true] %s48_s19  ;;  %s73_s21 = int_to_ptr.vmem [resolvable:$true] %s72_s21 }
   0x6   :  { %s3565_s24 = scalar_lea.hbm %s4201_s3, 32 }
   0x7   :  { %p3566_p0 = scmp.ne.s32.totalorder %s4201_s3, %s3565_s24  ;;  %p3569_p1 = scmp.lt.u32.totalorder %s3565_s24, %s4201_s3 }
   0x9   :  { %p3571_p2 = pnand %p3569_p1, %p3566_p0 }
   0xb   :  { %3574 = shalt.err (!%p3571_p2)
}
   0xc   :  { %s3575_s29 = scalar_lea.vmem %s49_s19, 32  ;;  %p3580_p4 = scmp.lt.s32.totalorder %s49_s19, %s49_s19 }
   0xd   :  { %p3576_p3 = scmp.ne.s32.totalorder %s49_s19, %s3575_s29  ;;  %p3581_p5 = scmp.lt.s32.totalorder %s3575_s29, %s3575_s29 }
   0xf   :  { %p3582_p6 = por %p3581_p5, %p3580_p4 }
  0x11   :  { %p3583_p7 = pnand %p3582_p6, %p3576_p3 }
  0x13   :  { %3586 = shalt.err (!%p3583_p7)
}
  0x14   :  { %51 = dma.hbm_to_vmem [thread:$0]  %s4201_s3, 32, %s49_s19, [#allocation5]  }
  0x15   :  { %s3587_s20 = scalar_lea.hbm %s4205_s7, 16 }
  0x16   :  { %p3588_p8 = scmp.ne.s32.totalorder %s4205_s7, %s3587_s20  ;;  %p3591_p9 = scmp.lt.u32.totalorder %s3587_s20, %s4205_s7 }
  0x18   :  { %p3593_p10 = pnand %p3591_p9, %p3588_p8 }
  0x1a   :  { %3596 = shalt.err (!%p3593_p10)
}
  0x1b   :  { %s3597_s26 = scalar_lea.vmem %s73_s21, 16  ;;  %s3601_s27 = scalar_lea.vmem %s73_s21, 32 }
  0x1c   :  { %p3598_p11 = scmp.ne.s32.totalorder %s73_s21, %s3597_s26  ;;  %p3602_p12 = scmp.lt.s32.totalorder %s73_s21, %s73_s21 }
  0x1d   :  { %p3603_p13 = scmp.lt.s32.totalorder %s3601_s27, %s3597_s26 }
  0x1f   :  { %p3604_p0 = por %p3603_p13, %p3602_p12 }
  0x21   :  { %p3605_p1 = pnand %p3604_p0, %p3598_p11 }
  0x23   :  { %3608 = shalt.err (!%p3605_p1)
}
  0x24   :  { %75 = dma.hbm_to_vmem [thread:$0]  %s4205_s7, 16, %s73_s21, [#allocation8]  }
  0x25   :  { %s3775_s28 = smov [#allocation10]   ;;  %s3776_s30 = smov [#allocation13]  }
  0x26   :  { %s94_s29 = sshll.u32 %s3775_s28, 4  ;;  %s116_s16 = sshll.u32 %s3776_s30, 4  ;;  %s95_s29 = int_to_ptr.vmem [resolvable:$true] %s94_s29  ;;  %s117_s16 = int_to_ptr.vmem [resolvable:$true] %s116_s16 }
  0x27   :  { %s3609_s20 = scalar_lea.hbm %s4207_s9, 16 }
  0x28   :  { %p3610_p2 = scmp.ne.s32.totalorder %s4207_s9, %s3609_s20  ;;  %p3613_p3 = scmp.lt.u32.totalorder %s3609_s20, %s4207_s9 }
  0x2a   :  { %p3615_p4 = pnand %p3613_p3, %p3610_p2 }
  0x2c   :  { %3618 = shalt.err (!%p3615_p4)
}
  0x2d   :  { %s3619_s7 = scalar_lea.vmem %s95_s29, 16  ;;  %s3623_s21 = scalar_lea.vmem %s95_s29, 32 }
  0x2e   :  { %p3620_p5 = scmp.ne.s32.totalorder %s95_s29, %s3619_s7  ;;  %p3624_p6 = scmp.lt.s32.totalorder %s95_s29, %s95_s29 }
  0x2f   :  { %p3625_p7 = scmp.lt.s32.totalorder %s3623_s21, %s3619_s7 }
  0x31   :  { %p3626_p8 = por %p3625_p7, %p3624_p6 }
  0x33   :  { %p3627_p9 = pnand %p3626_p8, %p3620_p5 }
  0x35   :  { %3630 = shalt.err (!%p3627_p9)
}
  0x36   :  { %97 = dma.hbm_to_vmem [thread:$0]  %s4207_s9, 16, %s95_s29, [#allocation11]  }
  0x37   :  { %s3631_s28 = scalar_lea.hbm %s4209_s11, 32 }
  0x38   :  { %p3632_p10 = scmp.ne.s32.totalorder %s4209_s11, %s3631_s28  ;;  %p3635_p11 = scmp.lt.u32.totalorder %s3631_s28, %s4209_s11 }
  0x3a   :  { %p3637_p12 = pnand %p3635_p11, %p3632_p10 }
  0x3c   :  { %3640 = shalt.err (!%p3637_p12)
}
  0x3d   :  { %s3641_s22 = scalar_lea.vmem %s117_s16, 32  ;;  %p3646_p0 = scmp.lt.s32.totalorder %s117_s16, %s117_s16 }
  0x3e   :  { %p3642_p13 = scmp.ne.s32.totalorder %s117_s16, %s3641_s22  ;;  %p3647_p1 = scmp.lt.s32.totalorder %s3641_s22, %s3641_s22 }
  0x40   :  { %p3648_p2 = por %p3647_p1, %p3646_p0 }
  0x42   :  { %p3649_p3 = pnand %p3648_p2, %p3642_p13 }
  0x44   :  { %3652 = shalt.err (!%p3649_p3)
}
  0x45   :  { %119 = dma.hbm_to_vmem [thread:$0]  %s4209_s11, 32, %s117_s16, [#allocation14]  }
  0x46   :  { %s3777_s23 = smov [#allocation2]   ;;  %s3653_s21 = scalar_lea.hbm %s4200_s2, 14336 }
  0x47   :  { %s35_s24 = sshll.u32 %s3777_s23, 4  ;;  %p3654_p4 = scmp.ne.s32.totalorder %s4200_s2, %s3653_s21  ;;  %s36_s24 = int_to_ptr.vmem [resolvable:$true] %s35_s24 }
  0x48   :  { %p3657_p5 = scmp.lt.u32.totalorder %s3653_s21, %s4200_s2 }
  0x4a   :  { %p3659_p6 = pnand %p3657_p5, %p3654_p4 }
  0x4c   :  { %3662 = shalt.err (!%p3659_p6)
}
  0x4d   :  { %s3663_s28 = scalar_lea.vmem %s36_s24, 14336  ;;  %p3668_p8 = scmp.lt.s32.totalorder %s36_s24, %s36_s24 }
  0x4e   :  { %p3664_p7 = scmp.ne.s32.totalorder %s36_s24, %s3663_s28  ;;  %p3669_p9 = scmp.lt.s32.totalorder %s3663_s28, %s3663_s28 }
  0x50   :  { %p3670_p10 = por %p3669_p9, %p3668_p8 }
  0x52   :  { %p3671_p11 = pnand %p3670_p10, %p3664_p7 }
  0x54   :  { %3674 = shalt.err (!%p3671_p11)
}
  0x55   :  { %s3778_s11 = smov 128   ;;  %s3779_s16 = smov 8  }
  0x56   :  { %41 = dma.hbm_to_vmem [thread:$0]  %s4200_s2, 14336, %s36_s24, [#allocation3], %s3778_s11, %s3778_s11, %s3779_s16  }
  0x57   :  { %s3780_s18 = smov [#allocation6]   ;;  %s3781_s22 = smov [#allocation9]  }
  0x58   :  { %s60_s20 = sshll.u32 %s3780_s18, 4  ;;  %s81_s9 = sshll.u32 %s3781_s22, 4  ;;  %s61_s20 = int_to_ptr.vmem [resolvable:$true] %s60_s20  ;;  %s82_s9 = int_to_ptr.vmem [resolvable:$true] %s81_s9 }
  0x59   :  { %s3675_s25 = scalar_lea.hbm %s4203_s5, 16 }
  0x5a   :  { %p3676_p12 = scmp.ne.s32.totalorder %s4203_s5, %s3675_s25  ;;  %p3679_p13 = scmp.lt.u32.totalorder %s3675_s25, %s4203_s5 }
  0x5c   :  { %p3681_p0 = pnand %p3679_p13, %p3676_p12 }
  0x5e   :  { %3684 = shalt.err (!%p3681_p0)
}
  0x5f   :  { %s3685_s2 = scalar_lea.vmem %s61_s20, 16  ;;  %s3689_s24 = scalar_lea.vmem %s61_s20, 32 }
  0x60   :  { %p3686_p1 = scmp.ne.s32.totalorder %s61_s20, %s3685_s2  ;;  %p3690_p2 = scmp.lt.s32.totalorder %s61_s20, %s61_s20 }
  0x61   :  { %p3691_p3 = scmp.lt.s32.totalorder %s3689_s24, %s3685_s2 }
  0x63   :  { %p3692_p4 = por %p3691_p3, %p3690_p2 }
  0x65   :  { %p3693_p5 = pnand %p3692_p4, %p3686_p1 }
  0x67   :  { %3696 = shalt.err (!%p3693_p5)
}
  0x68   :  { %63 = dma.hbm_to_vmem [thread:$0]  %s4203_s5, 16, %s61_s20, [#allocation5]  }
  0x69   :  { %s3697_s17 = scalar_lea.hbm %s4206_s8, 1024 }
  0x6a   :  { %p3698_p6 = scmp.ne.s32.totalorder %s4206_s8, %s3697_s17  ;;  %p3701_p7 = scmp.lt.u32.totalorder %s3697_s17, %s4206_s8 }
  0x6c   :  { %p3703_p8 = pnand %p3701_p7, %p3698_p6 }
  0x6e   :  { %3706 = shalt.err (!%p3703_p8)
}
  0x6f   :  { %s3707_s25 = scalar_lea.vmem %s82_s9, 1024  ;;  %p3712_p10 = scmp.lt.s32.totalorder %s82_s9, %s82_s9 }
  0x70   :  { %p3708_p9 = scmp.ne.s32.totalorder %s82_s9, %s3707_s25  ;;  %p3713_p11 = scmp.lt.s32.totalorder %s3707_s25, %s3707_s25 }
  0x72   :  { %p3714_p12 = por %p3713_p11, %p3712_p10 }
  0x74   :  { %p3715_p13 = pnand %p3714_p12, %p3708_p9 }
  0x76   :  { %3718 = shalt.err (!%p3715_p13)
}
  0x77   :  { %s3782_s5 = smov 64   ;;  %s3783_s20 = smov 4  }
  0x78   :  { %87 = dma.hbm_to_vmem [thread:$0]  %s4206_s8, 1024, %s82_s9, [#allocation8], %s3782_s5, %s3782_s5, %s3783_s20  }
  0x79   :  { %s3784_s26 = smov [#allocation12]   ;;  %s3785_s2 = smov [#allocation15]  }
  0x7a   :  { %s103_s27 = sshll.u32 %s3784_s26, 4  ;;  %s125_s24 = sshll.u32 %s3785_s2, 4  ;;  %s104_s27 = int_to_ptr.vmem [resolvable:$true] %s103_s27  ;;  %s126_s24 = int_to_ptr.vmem [resolvable:$true] %s125_s24 }
  0x7b   :  { %s3719_s28 = scalar_lea.hbm %s4208_s10, 2048 }
  0x7c   :  { %p3720_p0 = scmp.ne.s32.totalorder %s4208_s10, %s3719_s28  ;;  %p3723_p1 = scmp.lt.u32.totalorder %s3719_s28, %s4208_s10 }
  0x7e   :  { %p3725_p2 = pnand %p3723_p1, %p3720_p0 }
  0x80   :  { %3728 = shalt.err (!%p3725_p2)
}
  0x81   :  { %s3729_s8 = scalar_lea.vmem %s104_s27, 2048  ;;  %p3734_p4 = scmp.lt.s32.totalorder %s104_s27, %s104_s27 }
  0x82   :  { %p3730_p3 = scmp.ne.s32.totalorder %s104_s27, %s3729_s8  ;;  %p3735_p5 = scmp.lt.s32.totalorder %s3729_s8, %s3729_s8 }
  0x84   :  { %p3736_p6 = por %p3735_p5, %p3734_p4 }
  0x86   :  { %p3737_p7 = pnand %p3736_p6, %p3730_p3 }
  0x88   :  { %3740 = shalt.err (!%p3737_p7)
}
  0x89   :  { %109 = dma.hbm_to_vmem [thread:$0]  %s4208_s10, 2048, %s104_s27, [#allocation11], %s3778_s11, %s3778_s11, %s3779_s16  }
  0x8a   :  { %s3741_s5 = scalar_lea.hbm %s4210_s12, 14336 }
  0x8b   :  { %p3742_p8 = scmp.ne.s32.totalorder %s4210_s12, %s3741_s5  ;;  %p3745_p9 = scmp.lt.u32.totalorder %s3741_s5, %s4210_s12 }
  0x8d   :  { %p3747_p10 = pnand %p3745_p9, %p3742_p8 }
  0x8f   :  { %3750 = shalt.err (!%p3747_p10)
}
  0x90   :  { %s3751_s2 = scalar_lea.vmem %s126_s24, 14336  ;;  %p3756_p12 = scmp.lt.s32.totalorder %s126_s24, %s126_s24 }
  0x91   :  { %p3752_p11 = scmp.ne.s32.totalorder %s126_s24, %s3751_s2  ;;  %p3757_p13 = scmp.lt.s32.totalorder %s3751_s2, %s3751_s2 }
  0x93   :  { %p3758_p0 = por %p3757_p13, %p3756_p12 }
  0x95   :  { %p3759_p1 = pnand %p3758_p0, %p3752_p11 }
  0x97   :  { %3762 = shalt.err (!%p3759_p1)
}
  0x98   :  { %s3786_s10 = smov 448   ;;  %s3787_s11 = smov 28  }
  0x99   :  { %131 = dma.hbm_to_vmem [thread:$0]  %s4210_s12, 14336, %s126_s24, [#allocation14], %s3786_s10, %s3786_s10, %s3787_s11  }
  0x9a   :  { %3763 = dma.done.wait [#allocation3], 14336  }
  0x9b   :  { %3764 = vsyncadd [#allocation3], 4294952960 }
  0x9c   :  { %3765 = dma.done.wait [#allocation5], 48  }
  0x9d   :  { %3766 = vsyncadd [#allocation5], 4294967248 }
  0x9e   :  { %3767 = dma.done.wait [#allocation8], 1040  }
  0x9f   :  { %3768 = vsyncadd [#allocation8], 4294966256 }
  0xa0   :  { %3769 = dma.done.wait [#allocation11], 2064  }
  0xa1   :  { %3770 = vsyncadd [#allocation11], 4294965232 }
  0xa2   :  { %3771 = dma.done.wait [#allocation14], 14368  }
  0xa3   :  { %3772 = vsyncadd [#allocation14], 4294952928  ;;  %v3111_v0 = vld [vmem:[#allocation2 + $0x4] ss:$8 sps:$4 sm:$0xff]   ;;  %v3113_v1 = vld [vmem:[#allocation2] ss:$8 sps:$4 sm:$0xff]  }
  0xa4   :  { %890 = vmatprep.subr.bf16.mxu0 %v3111_v0  ;;  %v3114_v2 = vld [vmem:[#allocation2 + $0x14] ss:$8 sps:$4 sm:$0xff]   ;;  %v3116_v3 = vld [vmem:[#allocation2 + $0x10] ss:$8 sps:$4 sm:$0xff]   ;;  %v3117_v4 = vld [vmem:[#allocation2 + $0x24] ss:$8 sps:$4 sm:$0xff]  }
  0xa5   :  { %891 = vmatpush1.bf16.msra.mxu0 %v3113_v1  ;;  %v3119_v5 = vld [vmem:[#allocation2 + $0x20] ss:$8 sps:$4 sm:$0xff]   ;;  %v3120_v6 = vld [vmem:[#allocation2 + $0x34] ss:$8 sps:$4 sm:$0xff]   ;;  %v3122_v7 = vld [vmem:[#allocation2 + $0x30] ss:$8 sps:$4 sm:$0xff]  }
  0xa6   :  { %892 = vmatprep.subr.bf16.mxu0 %v3114_v2  ;;  %v3123_v8 = vld [vmem:[#allocation2 + $0x44] ss:$8 sps:$4 sm:$0xff]   ;;  %v3125_v9 = vld [vmem:[#allocation2 + $0x40] ss:$8 sps:$4 sm:$0xff]   ;;  %v3126_v10 = vld [vmem:[#allocation2 + $0x54] ss:$8 sps:$4 sm:$0xff]  }
  0xa7   :  { %v3128_v11 = vld [vmem:[#allocation2 + $0x50] ss:$8 sps:$4 sm:$0xff]   ;;  %v3129_v12 = vld [vmem:[#allocation2 + $0x64] ss:$8 sps:$4 sm:$0xff]   ;;  %v3131_v14 = vld [vmem:[#allocation2 + $0x60] ss:$8 sps:$4 sm:$0xff]  }
  0xa8   :  { %v3161_v13 = vld [vmem:[%s4198_s0 + $0x4] ss:$28 sps:$4 sm:$0xff]   ;;  %v3132_v15 = vld [vmem:[#allocation2 + $0x74] ss:$8 sps:$4 sm:$0xff]   ;;  %v3134_v16 = vld [vmem:[#allocation2 + $0x70] ss:$8 sps:$4 sm:$0xff]  }
  0xa9   :  { %893 = vmatpush1.bf16.msra.mxu0 %v3116_v3  ;;  %922 = vmatprep.mubr.bf16.mxu0 %v3161_v13  ;;  %v3135_v17 = vld [vmem:[#allocation2 + $0x84] ss:$8 sps:$4 sm:$0xff]   ;;  %v3137_v18 = vld [vmem:[#allocation2 + $0x80] ss:$8 sps:$4 sm:$0xff]   ;;  %v3138_v19 = vld [vmem:[#allocation2 + $0x94] ss:$8 sps:$4 sm:$0xff]  }
  0xaa   :  { %894 = vmatprep.subr.bf16.mxu0 %v3117_v4  ;;  %v3140_v20 = vld [vmem:[#allocation2 + $0x90] ss:$8 sps:$4 sm:$0xff]   ;;  %v3141_v21 = vld [vmem:[#allocation2 + $0xa4] ss:$8 sps:$4 sm:$0xff]   ;;  %v3143_v22 = vld [vmem:[#allocation2 + $0xa0] ss:$8 sps:$4 sm:$0xff]  }
  0xab   :  { %v3144_v23 = vld [vmem:[#allocation2 + $0xb4] ss:$8 sps:$4 sm:$0xff]   ;;  %v3146_v24 = vld [vmem:[#allocation2 + $0xb0] ss:$8 sps:$4 sm:$0xff]   ;;  %v3147_v25 = vld [vmem:[#allocation2 + $0xc4] ss:$8 sps:$4 sm:$0xff]  }
  0xac   :  { %v3149_v26 = vld [vmem:[#allocation2 + $0xc0] ss:$8 sps:$4 sm:$0xff]   ;;  %v3150_v27 = vld [vmem:[#allocation2 + $0xd4] ss:$8 sps:$4 sm:$0xff]   ;;  %v3152_v28 = vld [vmem:[#allocation2 + $0xd0] ss:$8 sps:$4 sm:$0xff]  }
  0xad   :  { %895 = vmatpush1.bf16.msra.mxu0 %v3119_v5  ;;  %v3153_v29 = vld [vmem:[#allocation2 + $0xe4] ss:$8 sps:$4 sm:$0xff]   ;;  %v3155_v30 = vld [vmem:[#allocation2 + $0xe0] ss:$8 sps:$4 sm:$0xff]   ;;  %v3156_v31 = vld [vmem:[#allocation2 + $0xf4] ss:$8 sps:$4 sm:$0xff]  }
  0xae   :  { %896 = vmatprep.subr.bf16.mxu0 %v3120_v6  ;;  %v3158_v32 = vld [vmem:[#allocation2 + $0xf0] ss:$8 sps:$4 sm:$0xff]   ;;  %v3164_v33 = vld [vmem:[#allocation2 + $0x104] ss:$8 sps:$4 sm:$0xff]   ;;  %v3159_v34 = vld [vmem:[%s4198_s0] ss:$28 sps:$4 sm:$0xff]  }
  0xaf   :  { %v3162_v35 = vld [vmem:[#allocation2 + $0x100] ss:$8 sps:$4 sm:$0xff]   ;;  %v3167_v37 = vld [vmem:[#allocation2 + $0x114] ss:$8 sps:$4 sm:$0xff]   ;;  %v3165_v38 = vld [vmem:[#allocation2 + $0x110] ss:$8 sps:$4 sm:$0xff]  }
  0xb0   :  { %v3212_v36 = vld [vmem:[%s4198_s0 + $0xc] ss:$28 sps:$4 sm:$0xff]   ;;  %v3173_v41 = vld [vmem:[#allocation2 + $0x134] ss:$8 sps:$4 sm:$0xff]   ;;  %v3171_v42 = vld [vmem:[#allocation2 + $0x130] ss:$8 sps:$4 sm:$0xff]  }
  0xb1   :  { %897 = vmatpush1.bf16.msra.mxu0 %v3122_v7  ;;  %v3170_v39 = vld [vmem:[#allocation2 + $0x124] ss:$8 sps:$4 sm:$0xff]   ;;  %v3168_v40 = vld [vmem:[#allocation2 + $0x120] ss:$8 sps:$4 sm:$0xff]   ;;  %v3179_v45 = vld [vmem:[#allocation2 + $0x154] ss:$8 sps:$4 sm:$0xff]  }
  0xb2   :  { %898 = vmatprep.subr.bf16.mxu0 %v3123_v8  ;;  %v3176_v43 = vld [vmem:[#allocation2 + $0x144] ss:$8 sps:$4 sm:$0xff]   ;;  %v3174_v44 = vld [vmem:[#allocation2 + $0x140] ss:$8 sps:$4 sm:$0xff]   ;;  %v3177_v46 = vld [vmem:[#allocation2 + $0x150] ss:$8 sps:$4 sm:$0xff]  }
  0xb3   :  { %v3182_v47 = vld [vmem:[#allocation2 + $0x164] ss:$8 sps:$4 sm:$0xff]   ;;  %v3180_v48 = vld [vmem:[#allocation2 + $0x160] ss:$8 sps:$4 sm:$0xff]   ;;  %v3185_v49 = vld [vmem:[#allocation2 + $0x174] ss:$8 sps:$4 sm:$0xff]  }
  0xb4   :  { %v3183_v50 = vld [vmem:[#allocation2 + $0x170] ss:$8 sps:$4 sm:$0xff]   ;;  %v3188_v51 = vld [vmem:[#allocation2 + $0x184] ss:$8 sps:$4 sm:$0xff]   ;;  %v3186_v52 = vld [vmem:[#allocation2 + $0x180] ss:$8 sps:$4 sm:$0xff]  }
  0xb5   :  { %899 = vmatpush1.bf16.msra.mxu0 %v3125_v9  ;;  %v3191_v53 = vld [vmem:[#allocation2 + $0x194] ss:$8 sps:$4 sm:$0xff]   ;;  %v3289_v54 = vld [vmem:[%s4202_s4 + $0x40] sm:$0xff]   ;;  %v3291_v56 = vld [vmem:[%s4202_s4 + $0x48] sm:$0xff]   ;;  %vm3790_vm0 = vmmov 0   ;;  %s3791_s25 = smov 96  }
  0xb6   :  { %900 = vmatprep.subr.bf16.mxu0 %v3126_v10  ;;  %v3290_v55 = vld [vmem:[%s4202_s4] sm:$0xff]   ;;  %v3189_v57 = vld [vmem:[#allocation2 + $0x190] ss:$8 sps:$4 sm:$0xff]   ;;  %2974 = vmatprep.subr.bf16.mxu1 %v3289_v54  ;;  %v3292_v60 = vld [vmem:[%s4202_s4 + $0x8] sm:$0xff]  }
  0xb7   :  { %v3194_v58 = vld [vmem:[#allocation2 + $0x1a4] ss:$8 sps:$4 sm:$0xff]   ;;  %v3192_v59 = vld [vmem:[#allocation2 + $0x1a0] ss:$8 sps:$4 sm:$0xff]   ;;  %2975 = vmatpush3.bf16.msra.mxu1 %v3290_v55  ;;  %v3293_v61 = vld [vmem:[%s4202_s4 + $0x50] sm:$0xff]  }
  0xb8   :  { %v3197_v62 = vld [vmem:[#allocation2 + $0x1b4] ss:$8 sps:$4 sm:$0xff]   ;;  %2976 = vmatprep.subr.bf16.mxu1 %v3291_v56  ;;  %v3195_v1 = vld [vmem:[#allocation2 + $0x1b0] ss:$8 sps:$4 sm:$0xff]   ;;  %v3200_v2 = vld [vmem:[#allocation2 + $0x1c4] ss:$8 sps:$4 sm:$0xff]  }
  0xb9   :  { %901 = vmatpush1.bf16.msra.mxu0 %v3128_v11  ;;  %v3294_v63 = vld [vmem:[%s4202_s4 + $0x10] sm:$0xff]   ;;  %v3295_v0 = vld [vmem:[%s4202_s4 + $0x58] sm:$0xff]   ;;  %v3297_v4 = vld [vmem:[%s4202_s4 + $0x60] sm:$0xff]  }
  0xba   :  { %902 = vmatprep.subr.bf16.mxu0 %v3129_v12  ;;  %v3296_v3 = vld [vmem:[%s4202_s4 + $0x18] sm:$0xff]   ;;  %v3198_v5 = vld [vmem:[#allocation2 + $0x1c0] ss:$8 sps:$4 sm:$0xff]   ;;  %v3206_v10 = vld [vmem:[#allocation2 + $0x1e4] ss:$8 sps:$4 sm:$0xff]  }
  0xbb   :  { %2977 = vmatpush3.bf16.msra.mxu1 %v3292_v60  ;;  %v3203_v6 = vld [vmem:[#allocation2 + $0x1d4] ss:$8 sps:$4 sm:$0xff]   ;;  %v3298_v7 = vld [vmem:[%s4202_s4 + $0x20] sm:$0xff]   ;;  %v3299_v8 = vld [vmem:[%s4202_s4 + $0x68] sm:$0xff]  }
  0xbc   :  { %2978 = vmatprep.subr.bf16.mxu1 %v3293_v61  ;;  %v3201_v9 = vld [vmem:[#allocation2 + $0x1d0] ss:$8 sps:$4 sm:$0xff]   ;;  %v3204_v11 = vld [vmem:[#allocation2 + $0x1e0] ss:$8 sps:$4 sm:$0xff]   ;;  %v3209_v12 = vld [vmem:[#allocation2 + $0x1f4] ss:$8 sps:$4 sm:$0xff]  }
  0xbd   :  { %903 = vmatpush1.bf16.msra.mxu0 %v3131_v14  ;;  %v3207_v13 = vld [vmem:[#allocation2 + $0x1f0] ss:$8 sps:$4 sm:$0xff]   ;;  %v3215_v14 = vld [vmem:[#allocation2 + $0x204] ss:$8 sps:$4 sm:$0xff]   ;;  %v3270_v55 = vld [vmem:[#allocation2 + $0x320] ss:$8 sps:$4 sm:$0xff]  }
  0xbe   :  { %904 = vmatprep.subr.bf16.mxu0 %v3132_v15  ;;  %v3210_v15 = vld [vmem:[%s4198_s0 + $0x8] ss:$28 sps:$4 sm:$0xff]   ;;  %v3275_v56 = vld [vmem:[#allocation2 + $0x334] ss:$8 sps:$4 sm:$0xff]   ;;  %v3279_v61 = vld [vmem:[#allocation2 + $0x350] ss:$8 sps:$4 sm:$0xff]  }
  0xbf   :  { %2979 = vmatpush3.bf16.msra.mxu1 %v3294_v63  ;;  %v3272_v54 = vld [vmem:[#allocation2 + $0x324] ss:$8 sps:$4 sm:$0xff]   ;;  %v3281_v60 = vld [vmem:[#allocation2 + $0x354] ss:$8 sps:$4 sm:$0xff]   ;;  %v3282_v63 = vld [vmem:[#allocation2 + $0x360] ss:$8 sps:$4 sm:$0xff]  }
  0xc0   :  { %2980 = vmatprep.subr.bf16.mxu1 %v3295_v0  ;;  %v3287_v0 = vld [vmem:[#allocation2 + $0x374] ss:$8 sps:$4 sm:$0xff]  }
  0xc1   :  { %905 = vmatpush1.bf16.msra.mxu0 %v3134_v16  ;;  %v3213_v16 = vld [vmem:[#allocation2 + $0x200] ss:$8 sps:$4 sm:$0xff]  }
  0xc2   :  { %906 = vmatprep.subr.bf16.mxu0 %v3135_v17  ;;  %v3263_v17 = vld [vmem:[%s4198_s0 + $0x14] ss:$28 sps:$4 sm:$0xff]  }
  0xc3   :  { %2981 = vmatpush3.bf16.msra.mxu1 %v3296_v3  ;;  %v3300_v3 = vld [vmem:[%s4202_s4 + $0x28] sm:$0xff]  }
  0xc4   :  { %2982 = vmatprep.subr.bf16.mxu1 %v3297_v4  ;;  %v3301_v4 = vld [vmem:[%s4202_s4 + $0x70] sm:$0xff]  }
  0xc5   :  { %907 = vmatpush1.bf16.msra.mxu0 %v3137_v18  ;;  %v3218_v18 = vld [vmem:[#allocation2 + $0x214] ss:$8 sps:$4 sm:$0xff]  }
  0xc6   :  { %908 = vmatprep.subr.bf16.mxu0 %v3138_v19  ;;  %v3216_v19 = vld [vmem:[#allocation2 + $0x210] ss:$8 sps:$4 sm:$0xff]  }
  0xc7   :  { %2983 = vmatpush3.bf16.msra.mxu1 %v3298_v7  ;;  %v3304_v7 = vld [vmem:[%s4202_s4 + $0x38] sm:$0xff]  }
  0xc8   :  { %2984 = vmatprep.subr.bf16.mxu1 %v3299_v8  ;;  %v3789_v8 = vmov 0.0  }
  0xc9   :  { %909 = vmatpush1.bf16.msra.mxu0 %v3140_v20  ;;  %v3221_v20 = vld [vmem:[#allocation2 + $0x224] ss:$8 sps:$4 sm:$0xff]  }
  0xca   :  { %910 = vmatprep.subr.bf16.mxu0 %v3141_v21  ;;  %v3219_v21 = vld [vmem:[#allocation2 + $0x220] ss:$8 sps:$4 sm:$0xff]  }
  0xcb   :  { %2985 = vmatpush3.bf16.msra.mxu1 %v3300_v3 }
  0xcc   :  { %2986 = vmatprep.subr.bf16.mxu1 %v3301_v4  ;;  %v3319_v4 = vld [vmem:[#allocation9 + $0x30] sm:$0xff]  }
  0xcd   :  { %911 = vmatpush1.bf16.msra.mxu0 %v3143_v22  ;;  %v3224_v22 = vld [vmem:[#allocation2 + $0x234] ss:$8 sps:$4 sm:$0xff]  }
  0xce   :  { %912 = vmatprep.subr.bf16.mxu0 %v3144_v23  ;;  %v3222_v23 = vld [vmem:[#allocation2 + $0x230] ss:$8 sps:$4 sm:$0xff]  }
  0xd1   :  { %913 = vmatpush1.bf16.msra.mxu0 %v3146_v24  ;;  %v3227_v24 = vld [vmem:[#allocation2 + $0x244] ss:$8 sps:$4 sm:$0xff]  }
  0xd2   :  { %914 = vmatprep.subr.bf16.mxu0 %v3147_v25  ;;  %v3225_v25 = vld [vmem:[#allocation2 + $0x240] ss:$8 sps:$4 sm:$0xff]  }
  0xd5   :  { %915 = vmatpush1.bf16.msra.mxu0 %v3149_v26  ;;  %v3230_v26 = vld [vmem:[#allocation2 + $0x254] ss:$8 sps:$4 sm:$0xff]  }
  0xd6   :  { %916 = vmatprep.subr.bf16.mxu0 %v3150_v27  ;;  %v3228_v27 = vld [vmem:[#allocation2 + $0x250] ss:$8 sps:$4 sm:$0xff]  }
  0xd9   :  { %917 = vmatpush1.bf16.msra.mxu0 %v3152_v28  ;;  %v3233_v28 = vld [vmem:[#allocation2 + $0x264] ss:$8 sps:$4 sm:$0xff]  }
  0xda   :  { %918 = vmatprep.subr.bf16.mxu0 %v3153_v29  ;;  %v3231_v29 = vld [vmem:[#allocation2 + $0x260] ss:$8 sps:$4 sm:$0xff]  }
  0xdd   :  { %919 = vmatpush1.bf16.msra.mxu0 %v3155_v30  ;;  %v3236_v30 = vld [vmem:[#allocation2 + $0x274] ss:$8 sps:$4 sm:$0xff]  }
  0xde   :  { %920 = vmatprep.subr.bf16.mxu0 %v3156_v31  ;;  %v3234_v31 = vld [vmem:[#allocation2 + $0x270] ss:$8 sps:$4 sm:$0xff]  }
  0xe1   :  { %921 = vmatpush1.bf16.msra.mxu0 %v3158_v32  ;;  %v3239_v32 = vld [vmem:[#allocation2 + $0x284] ss:$8 sps:$4 sm:$0xff]  }
  0xe2   :  { %933 = vmatprep.subr.bf16.mxu0 %v3164_v33  ;;  %v3237_v33 = vld [vmem:[#allocation2 + $0x280] ss:$8 sps:$4 sm:$0xff]  }
  0xe4   :  { %923 = vmatmul.mubr.bf16.vlgmr.msra.gmra.mrb[0].mxu0 %v3159_v34  ;;  %v3242_v34 = vld [vmem:[#allocation2 + $0x294] ss:$8 sps:$4 sm:$0xff]  }
  0xe5   :  { %934 = vmatpush1.bf16.msra.mxu0 %v3162_v35  ;;  %965 = vmatprep.mubr.bf16.mxu0 %v3212_v36  ;;  %v3240_v35 = vld [vmem:[#allocation2 + $0x290] ss:$8 sps:$4 sm:$0xff]   ;;  %v3245_v36 = vld [vmem:[#allocation2 + $0x2a4] ss:$8 sps:$4 sm:$0xff]  }
  0xe6   :  { %935 = vmatprep.subr.bf16.mxu0 %v3167_v37  ;;  %v3243_v37 = vld [vmem:[#allocation2 + $0x2a0] ss:$8 sps:$4 sm:$0xff]  }
  0xe9   :  { %936 = vmatpush1.bf16.msra.mxu0 %v3165_v38  ;;  %v3248_v38 = vld [vmem:[#allocation2 + $0x2b4] ss:$8 sps:$4 sm:$0xff]  }
  0xea   :  { %937 = vmatprep.subr.bf16.mxu0 %v3170_v39  ;;  %v3246_v39 = vld [vmem:[#allocation2 + $0x2b0] ss:$8 sps:$4 sm:$0xff]  }
  0xed   :  { %938 = vmatpush1.bf16.msra.mxu0 %v3168_v40  ;;  %v3251_v40 = vld [vmem:[#allocation2 + $0x2c4] ss:$8 sps:$4 sm:$0xff]  }
  0xee   :  { %939 = vmatprep.subr.bf16.mxu0 %v3173_v41  ;;  %v3249_v41 = vld [vmem:[#allocation2 + $0x2c0] ss:$8 sps:$4 sm:$0xff]  }
  0xf1   :  { %940 = vmatpush1.bf16.msra.mxu0 %v3171_v42  ;;  %v3254_v42 = vld [vmem:[#allocation2 + $0x2d4] ss:$8 sps:$4 sm:$0xff]  }
  0xf2   :  { %941 = vmatprep.subr.bf16.mxu0 %v3176_v43  ;;  %v3252_v43 = vld [vmem:[#allocation2 + $0x2d0] ss:$8 sps:$4 sm:$0xff]  }
  0xf5   :  { %942 = vmatpush1.bf16.msra.mxu0 %v3174_v44  ;;  %v3257_v44 = vld [vmem:[#allocation2 + $0x2e4] ss:$8 sps:$4 sm:$0xff]  }
  0xf6   :  { %943 = vmatprep.subr.bf16.mxu0 %v3179_v45  ;;  %v3255_v45 = vld [vmem:[#allocation2 + $0x2e0] ss:$8 sps:$4 sm:$0xff]  }
  0xf9   :  { %944 = vmatpush1.bf16.msra.mxu0 %v3177_v46  ;;  %v3260_v46 = vld [vmem:[#allocation2 + $0x2f4] ss:$8 sps:$4 sm:$0xff]  }
  0xfa   :  { %945 = vmatprep.subr.bf16.mxu0 %v3182_v47  ;;  %v3258_v47 = vld [vmem:[#allocation2 + $0x2f0] ss:$8 sps:$4 sm:$0xff]  }
  0xfd   :  { %946 = vmatpush1.bf16.msra.mxu0 %v3180_v48  ;;  %v3266_v48 = vld [vmem:[#allocation2 + $0x304] ss:$8 sps:$4 sm:$0xff]  }
  0xfe   :  { %947 = vmatprep.subr.bf16.mxu0 %v3185_v49  ;;  %v3261_v49 = vld [vmem:[%s4198_s0 + $0x10] ss:$28 sps:$4 sm:$0xff]  }
 0x101   :  { %948 = vmatpush1.bf16.msra.mxu0 %v3183_v50  ;;  %v3264_v50 = vld [vmem:[#allocation2 + $0x300] ss:$8 sps:$4 sm:$0xff]  }
 0x102   :  { %949 = vmatprep.subr.bf16.mxu0 %v3188_v51  ;;  %v3269_v51 = vld [vmem:[#allocation2 + $0x314] ss:$8 sps:$4 sm:$0xff]  }
 0x105   :  { %950 = vmatpush1.bf16.msra.mxu0 %v3186_v52  ;;  %v3267_v52 = vld [vmem:[#allocation2 + $0x310] ss:$8 sps:$4 sm:$0xff]  }
 0x106   :  { %951 = vmatprep.subr.bf16.mxu0 %v3191_v53  ;;  %v3788_v53 = vmov 0  }
 0x109   :  { %952 = vmatpush1.bf16.msra.mxu0 %v3189_v57  ;;  %v3273_v57 = vld [vmem:[#allocation2 + $0x330] ss:$8 sps:$4 sm:$0xff]  }
 0x10a   :  { %953 = vmatprep.subr.bf16.mxu0 %v3194_v58  ;;  %v3278_v58 = vld [vmem:[#allocation2 + $0x344] ss:$8 sps:$4 sm:$0xff]  }
 0x10d   :  { %954 = vmatpush1.bf16.msra.mxu0 %v3192_v59  ;;  %v3276_v59 = vld [vmem:[#allocation2 + $0x340] ss:$8 sps:$4 sm:$0xff]  }
 0x10e   :  { %955 = vmatprep.subr.bf16.mxu0 %v3197_v62  ;;  %v3284_v62 = vld [vmem:[#allocation2 + $0x364] ss:$8 sps:$4 sm:$0xff]  }
 0x111   :  { %956 = vmatpush1.bf16.msra.mxu0 %v3195_v1  ;;  %v3285_v1 = vld [vmem:[#allocation2 + $0x370] ss:$8 sps:$4 sm:$0xff]  }
 0x112   :  { %957 = vmatprep.subr.bf16.mxu0 %v3200_v2  ;;  %v3288_v2 = vld [vmem:[%s4198_s0 + $0x18] ss:$28 sps:$4 sm:$0xff]  }
 0x115   :  { %958 = vmatpush1.bf16.msra.mxu0 %v3198_v5  ;;  %v3302_v5 = vld [vmem:[%s4202_s4 + $0x30] sm:$0xff]  }
 0x116   :  { %959 = vmatprep.subr.bf16.mxu0 %v3203_v6  ;;  %2987 = vmatpush3.bf16.msra.mxu1 %v3302_v5  ;;  %v3303_v6 = vld [vmem:[%s4202_s4 + $0x78] sm:$0xff]  }
 0x117   :  { %2988 = vmatprep.subr.bf16.mxu1 %v3303_v6  ;;  %v3320_v5 = vld [vmem:[#allocation9 + $0x38] sm:$0xff]   ;;  %v3323_v6 = vld [vmem:[#allocation12 + $0x4] ss:$8 sps:$4 sm:$0xff]  }
 0x119   :  { %960 = vmatpush1.bf16.msra.mxu0 %v3201_v9  ;;  %v284_v9 = vlaneseq }
 0x11a   :  { %961 = vmatprep.subr.bf16.mxu0 %v3206_v10  ;;  %2989 = vmatpush3.bf16.msra.mxu1 %v3304_v7 }
 0x11b   :  { %3036 = vmatprep.subr.bf16.mxu1 %v3789_v8  ;;  %v4057_v10 = vshrl.u32 %v284_v9, 7 }
 0x11d   :  { %962 = vmatpush1.bf16.msra.mxu0 %v3204_v11  ;;  %v4060_v11 = vsub.s32 0, %v4057_v10 }
 0x11e   :  { %963 = vmatprep.subr.bf16.mxu0 %v3209_v12  ;;  %v282_v12 = vld [vmem:[#allocation4] sm:$0x3] }
 0x121   :  { %964 = vmatpush1.bf16.msra.mxu0 %v3207_v13  ;;  %v4063_v13 = vsub.s32 1, %v4057_v10 }
 0x122   :  { %976 = vmatprep.subr.bf16.mxu0 %v3215_v14  ;;  %v287_v14 = vrot.slane %v282_v12, %v4060_v11 }
 0x124   :  { %966 = vmatmul.mubr.bf16.vlgmr.msra.gmra.mrb[0].mxu0 %v3210_v15  ;;  %v291_v15 = vrot.slane %v282_v12, %v4063_v13 }
 0x125   :  { %977 = vmatpush1.bf16.msra.mxu0 %v3213_v16  ;;  %1008 = vmatprep.mubr.bf16.mxu0 %v3263_v17 }
 0x126   :  { %978 = vmatprep.subr.bf16.mxu0 %v3218_v18 }
 0x129   :  { %979 = vmatpush1.bf16.msra.mxu0 %v3216_v19 }
 0x12a   :  { %980 = vmatprep.subr.bf16.mxu0 %v3221_v20 }
 0x12d   :  { %981 = vmatpush1.bf16.msra.mxu0 %v3219_v21 }
 0x12e   :  { %982 = vmatprep.subr.bf16.mxu0 %v3224_v22 }
 0x131   :  { %983 = vmatpush1.bf16.msra.mxu0 %v3222_v23 }
 0x132   :  { %984 = vmatprep.subr.bf16.mxu0 %v3227_v24 }
 0x135   :  { %985 = vmatpush1.bf16.msra.mxu0 %v3225_v25 }
 0x136   :  { %986 = vmatprep.subr.bf16.mxu0 %v3230_v26 }
 0x139   :  { %987 = vmatpush1.bf16.msra.mxu0 %v3228_v27 }
 0x13a   :  { %988 = vmatprep.subr.bf16.mxu0 %v3233_v28 }
 0x13d   :  { %989 = vmatpush1.bf16.msra.mxu0 %v3231_v29 }
 0x13e   :  { %990 = vmatprep.subr.bf16.mxu0 %v3236_v30  ;;  %v3305_v30 = vld [vmem:[%s4204_s6] sm:$0xff]  }
 0x141   :  { %991 = vmatpush1.bf16.msra.mxu0 %v3234_v31  ;;  %v3306_v31 = vld [vmem:[%s4204_s6 + $0x8] sm:$0xff]  }
 0x142   :  { %992 = vmatprep.subr.bf16.mxu0 %v3239_v32  ;;  %v3307_v32 = vld [vmem:[%s4204_s6 + $0x10] sm:$0xff]  }
 0x145   :  { %993 = vmatpush1.bf16.msra.mxu0 %v3237_v33  ;;  %v3308_v33 = vld [vmem:[%s4204_s6 + $0x18] sm:$0xff]  }
 0x146   :  { %994 = vmatprep.subr.bf16.mxu0 %v3242_v34  ;;  %v3309_v34 = vld [vmem:[%s4204_s6 + $0x20] sm:$0xff]  }
 0x149   :  { %995 = vmatpush1.bf16.msra.mxu0 %v3240_v35  ;;  %v3310_v35 = vld [vmem:[%s4204_s6 + $0x28] sm:$0xff]  }
 0x14a   :  { %996 = vmatprep.subr.bf16.mxu0 %v3245_v36  ;;  %v3311_v36 = vld [vmem:[%s4204_s6 + $0x30] sm:$0xff]  }
 0x14d   :  { %997 = vmatpush1.bf16.msra.mxu0 %v3243_v37  ;;  %v3312_v37 = vld [vmem:[%s4204_s6 + $0x38] sm:$0xff]  }
 0x14e   :  { %998 = vmatprep.subr.bf16.mxu0 %v3248_v38 }
 0x151   :  { %999 = vmatpush1.bf16.msra.mxu0 %v3246_v39  ;;  %v2797_v39 = vld [vmem:[#allocation6] ss:$0 sm:$0xff] }
 0x152   :  { %1000 = vmatprep.subr.bf16.mxu0 %v3251_v40 }
 0x155   :  { %1001 = vmatpush1.bf16.msra.mxu0 %v3249_v41 }
 0x156   :  { %1002 = vmatprep.subr.bf16.mxu0 %v3254_v42 }
 0x159   :  { %1003 = vmatpush1.bf16.msra.mxu0 %v3252_v43 }
 0x15a   :  { %1004 = vmatprep.subr.bf16.mxu0 %v3257_v44 }
 0x15d   :  { %1005 = vmatpush1.bf16.msra.mxu0 %v3255_v45 }
 0x15e   :  { %1006 = vmatprep.subr.bf16.mxu0 %v3260_v46 }
 0x161   :  { %1007 = vmatpush1.bf16.msra.mxu0 %v3258_v47 }
 0x162   :  { %1019 = vmatprep.subr.bf16.mxu0 %v3266_v48 }
 0x164   :  { %1009 = vmatmul.mubr.bf16.vlgmr.msra.gmra.mrb[0].mxu0 %v3261_v49 }
 0x165   :  { %1020 = vmatpush1.bf16.msra.mxu0 %v3264_v50  ;;  %1051 = vmatprep.mubr.bf16.mxu0 %v3788_v53 }
 0x166   :  { %1021 = vmatprep.subr.bf16.mxu0 %v3269_v51 }
 0x169   :  { %1022 = vmatpush1.bf16.msra.mxu0 %v3267_v52  ;;  %v3313_v52 = vld [vmem:[#allocation9] sm:$0xff]  }
 0x16a   :  { %1023 = vmatprep.subr.bf16.mxu0 %v3272_v54  ;;  %v3314_v54 = vld [vmem:[#allocation9 + $0x8] sm:$0xff]  }
 0x16d   :  { %1024 = vmatpush1.bf16.msra.mxu0 %v3270_v55  ;;  %v3315_v55 = vld [vmem:[#allocation9 + $0x10] sm:$0xff]  }
 0x16e   :  { %1025 = vmatprep.subr.bf16.mxu0 %v3275_v56  ;;  %v3316_v56 = vld [vmem:[#allocation9 + $0x18] sm:$0xff]  }
 0x171   :  { %1026 = vmatpush1.bf16.msra.mxu0 %v3273_v57  ;;  %v2814_v57 = vld [vmem:[#allocation7] ss:$0 sm:$0xff] }
 0x172   :  { %1027 = vmatprep.subr.bf16.mxu0 %v3278_v58 }
 0x175   :  { %1028 = vmatpush1.bf16.msra.mxu0 %v3276_v59  ;;  %v3317_v59 = vld [vmem:[#allocation9 + $0x20] sm:$0xff]  }
 0x176   :  { %1029 = vmatprep.subr.bf16.mxu0 %v3281_v60 }
 0x179   :  { %1030 = vmatpush1.bf16.msra.mxu0 %v3279_v61 }
 0x17a   :  { %1031 = vmatprep.subr.bf16.mxu0 %v3284_v62 }
 0x17d   :  { %1032 = vmatpush1.bf16.msra.mxu0 %v3282_v63  ;;  %v3318_v63 = vld [vmem:[#allocation9 + $0x28] sm:$0xff]  }
 0x17e   :  { %1033 = vmatprep.subr.bf16.mxu0 %v3287_v0 }
 0x181   :  { %1034 = vmatpush1.bf16.msra.mxu0 %v3285_v1 }
 0x184   :  { %1052 = vmatmul.mubr.bf16.vlgmr.msra.gmra.mrb[0].mxu0 %v3288_v2 }
 0x257   :  { %v1053_v16 = vpop.f32.mrb[0].mxu0 }
 0x258   :  { %v3076_v17 = vadd.f32 %v1053_v16, %v287_v14  ;;  %v1055_v18 = vpop.f32.mrb[1].mxu0 }
 0x259   :  { %v3077_v19 = vadd.f32 %v1055_v18, %v291_v15  ;;  %v1057_v20 = vpop.f32.mrb[2].mxu0  ;;  %v1371_v18 = vld [vmem:[%s4199_s1] sm:$0xff] }
 0x25a   :  { %v3078_v21 = vadd.f32 %v1057_v20, %v287_v14  ;;  %v1059_v22 = vpop.f32.mrb[3].mxu0  ;;  %v1062_v24 = vmax.f32 %v3076_v17, 0.0 }
 0x25b   :  { %v3079_v23 = vadd.f32 %v1059_v22, %v291_v15  ;;  %v1063_v26 = vmax.f32 %v3077_v19, 0.0 }
 0x25c   :  { %v1064_v25 = vmax.f32 %v3078_v21, 0.0 }
 0x25d   :  { %v1065_v27 = vmax.f32 %v3079_v23, 0.0 }
 0x25e   :  { %v1066_v28 = vpack.c.bf16 %v1064_v25, %v1062_v24  ;;  %v3321_v24 = vld [vmem:[#allocation12] ss:$8 sps:$4 sm:$0xff]  }
 0x25f   :  { %v1067_v29 = vpack.c.bf16 %v1065_v27, %v1063_v26  ;;  %v3326_v26 = vld [vmem:[#allocation12 + $0x14] ss:$8 sps:$4 sm:$0xff]   ;;  %v3324_v27 = vld [vmem:[#allocation12 + $0x10] ss:$8 sps:$4 sm:$0xff]  }
 0x261   :  { %1235 = vmatprep.mubr.bf16.mxu1 %v1067_v29  ;;  %v3327_v29 = vld [vmem:[#allocation12 + $0x20] ss:$8 sps:$4 sm:$0xff]  }
 0x262   :  { %1236 = vmatmul.mubr.bf16.vlgmr.msra.gmra.mrb[0].mxu1 %v1066_v28  ;;  %v3329_v28 = vld [vmem:[#allocation12 + $0x24] ss:$8 sps:$4 sm:$0xff]  }
 0x263   :  { %3037 = vmatpush3.bf16.msra.mxu1 %v3305_v30  ;;  %3052 = vmatprep.mubr.msk.bf16.mxu1 %vm3790_vm0, %v3789_v8  ;;  %v3332_v30 = vld [vmem:[#allocation12 + $0x34] ss:$8 sps:$4 sm:$0xff]  }
 0x264   :  { %3038 = vmatprep.subr.bf16.mxu1 %v3789_v8 }
 0x267   :  { %3039 = vmatpush3.bf16.msra.mxu1 %v3306_v31  ;;  %v3330_v31 = vld [vmem:[#allocation12 + $0x30] ss:$8 sps:$4 sm:$0xff]  }
 0x268   :  { %3040 = vmatprep.subr.bf16.mxu1 %v3789_v8 }
 0x26b   :  { %3041 = vmatpush3.bf16.msra.mxu1 %v3307_v32  ;;  %v3335_v32 = vld [vmem:[#allocation12 + $0x44] ss:$8 sps:$4 sm:$0xff]  }
 0x26c   :  { %3042 = vmatprep.subr.bf16.mxu1 %v3789_v8 }
 0x26f   :  { %3043 = vmatpush3.bf16.msra.mxu1 %v3308_v33  ;;  %v3333_v33 = vld [vmem:[#allocation12 + $0x40] ss:$8 sps:$4 sm:$0xff]  }
 0x270   :  { %3044 = vmatprep.subr.bf16.mxu1 %v3789_v8 }
 0x273   :  { %3045 = vmatpush3.bf16.msra.mxu1 %v3309_v34  ;;  %v3338_v34 = vld [vmem:[#allocation12 + $0x54] ss:$8 sps:$4 sm:$0xff]  }
 0x274   :  { %3046 = vmatprep.subr.bf16.mxu1 %v3789_v8 }
 0x277   :  { %3047 = vmatpush3.bf16.msra.mxu1 %v3310_v35  ;;  %v3336_v35 = vld [vmem:[#allocation12 + $0x50] ss:$8 sps:$4 sm:$0xff]  }
 0x278   :  { %3048 = vmatprep.subr.bf16.mxu1 %v3789_v8 }
 0x27b   :  { %3049 = vmatpush3.bf16.msra.mxu1 %v3311_v36  ;;  %v3341_v36 = vld [vmem:[#allocation12 + $0x64] ss:$8 sps:$4 sm:$0xff]  }
 0x27c   :  { %3050 = vmatprep.subr.bf16.mxu1 %v3789_v8 }
 0x27f   :  { %3051 = vmatpush3.bf16.msra.mxu1 %v3312_v37  ;;  %v3344_v37 = vld [vmem:[#allocation12 + $0x74] ss:$8 sps:$4 sm:$0xff]  }
 0x280   :  { %3056 = vmatprep.subr.bf16.mxu1 %v3789_v8 }
 0x335   :  { %v2990_v38 = vpop.f32.mrb[0].mxu1 }
 0x336   :  { %v2991_v40 = vpop.f32.mrb[1].mxu1 }
 0x337   :  { %v2992_v41 = vadd.f32 %v2991_v40, %v2990_v38  ;;  %v2993_v42 = vpop.f32.mrb[2].mxu1  ;;  %v3342_v38 = vld [vmem:[#allocation12 + $0x70] ss:$8 sps:$4 sm:$0xff]  }
 0x338   :  { %v2994_v43 = vpop.f32.mrb[3].mxu1  ;;  %v3348_v40 = vld [vmem:[#allocation15 + $0x10] ss:$28 sps:$4 sm:$0xff]  }
 0x339   :  { %v1238_v44 = vadd.f32 %v2992_v41, %v2797_v39  ;;  %v2995_v45 = vadd.f32 %v2994_v43, %v2993_v42  ;;  %v3350_v41 = vld [vmem:[#allocation15 + $0x14] ss:$28 sps:$4 sm:$0xff]   ;;  %v3354_v42 = vld [vmem:[#allocation15 + $0x48] ss:$28 sps:$4 sm:$0xff]  }
 0x33a   :  { %2483 = vmatprep.subr.bf16.mxu0 %v3350_v41  ;;  %v3356_v43 = vld [vmem:[#allocation15 + $0x4c] ss:$28 sps:$4 sm:$0xff]   ;;  %v3417_v41 = vld [vmem:[#allocation15 + $0x2a0] ss:$28 sps:$4 sm:$0xff]  }
 0x33b   :  { %v1246_v46 = vmul.f32 0.01, %v1238_v44  ;;  %v1241_v47 = vadd.f32 %v2995_v45, %v2797_v39  ;;  %vm1244_vm1 = vcmp.ge.f32.partialorder %v1238_v44, 0.0  ;;  %v3347_v39 = vld [vmem:[#allocation15 + $0x4] ss:$28 sps:$4 sm:$0xff]   ;;  %2484 = vmatpush1.bf16.msra.mxu0 %v3348_v40 }
 0x33c   :  { %2485 = vmatprep.subr.bf16.mxu0 %v3356_v43  ;;  %v3362_v45 = vld [vmem:[#allocation15 + $0x84] ss:$28 sps:$4 sm:$0xff]   ;;  %v3423_v43 = vld [vmem:[#allocation15 + $0x2d8] ss:$28 sps:$4 sm:$0xff]  }
 0x33d   :  { %vm1245_vm2 = vcmp.ge.f32.partialorder %v1241_v47, 0.0  ;;  %v1247_v48 = vmul.f32 0.01, %v1241_v47  ;;  %v1248_v49 = vsel %vm1244_vm1, %v1238_v44, %v1246_v46  ;;  %v3360_v44 = vld [vmem:[#allocation15 + $0x80] ss:$28 sps:$4 sm:$0xff]  }
 0x33e   :  { %v3366_v46 = vld [vmem:[#allocation15 + $0xb8] ss:$28 sps:$4 sm:$0xff]   ;;  %v3419_v40 = vld [vmem:[#allocation15 + $0x2a4] ss:$28 sps:$4 sm:$0xff]  }
 0x33f   :  { %v1249_v50 = vsel %vm1245_vm2, %v1241_v47, %v1247_v48  ;;  %2486 = vmatpush1.bf16.msra.mxu0 %v3354_v42  ;;  %v3368_v47 = vld [vmem:[#allocation15 + $0xbc] ss:$28 sps:$4 sm:$0xff]   ;;  %v3372_v48 = vld [vmem:[#allocation15 + $0xf0] ss:$28 sps:$4 sm:$0xff]  }
 0x340   :  { %v1250_v51 = vpack.c.bf16 %v1249_v50, %v1248_v49  ;;  %2487 = vmatprep.subr.bf16.mxu0 %v3362_v45  ;;  %v3374_v49 = vld [vmem:[#allocation15 + $0xf4] ss:$28 sps:$4 sm:$0xff]   ;;  %v3378_v50 = vld [vmem:[#allocation15 + $0x128] ss:$28 sps:$4 sm:$0xff]   ;;  %v3425_v42 = vld [vmem:[#allocation15 + $0x2dc] ss:$28 sps:$4 sm:$0xff]  }
 0x341   :  { %v3429_v45 = vld [vmem:[#allocation15 + $0x310] ss:$28 sps:$4 sm:$0xff]  }
 0x342   :  { %3053 = vmatmul.mubr.bf16.vlgmr.msra.gmra.mrb[4].mxu1 %v1250_v51  ;;  %v3380_v51 = vld [vmem:[#allocation15 + $0x12c] ss:$28 sps:$4 sm:$0xff]  }
 0x343   :  { %3072 = vmatprep.mubr.msk.bf16.mxu1 %vm3790_vm0, %v3789_v8  ;;  %3057 = vmatpush3.bf16.msra.mxu1 %v3313_v52  ;;  %v3384_v52 = vld [vmem:[#allocation15 + $0x160] ss:$28 sps:$4 sm:$0xff]  }
 0x344   :  { %3058 = vmatprep.subr.bf16.mxu1 %v3789_v8  ;;  %2488 = vmatpush1.bf16.msra.mxu0 %v3360_v44  ;;  %v3431_v44 = vld [vmem:[#allocation15 + $0x314] ss:$28 sps:$4 sm:$0xff]  }
 0x345   :  { %2489 = vmatprep.subr.bf16.mxu0 %v3368_v47  ;;  %v3432_v47 = vld [vmem:[#allocation15 + $0x320] ss:$28 sps:$4 sm:$0xff]  }
 0x347   :  { %3059 = vmatpush3.bf16.msra.mxu1 %v3314_v54  ;;  %v3386_v54 = vld [vmem:[#allocation15 + $0x164] ss:$28 sps:$4 sm:$0xff]  }
 0x348   :  { %3060 = vmatprep.subr.bf16.mxu1 %v3789_v8  ;;  %2490 = vmatpush1.bf16.msra.mxu0 %v3366_v46  ;;  %v3434_v46 = vld [vmem:[#allocation15 + $0x324] ss:$28 sps:$4 sm:$0xff]  }
 0x349   :  { %2491 = vmatprep.subr.bf16.mxu0 %v3374_v49  ;;  %v3435_v49 = vld [vmem:[#allocation15 + $0x348] ss:$28 sps:$4 sm:$0xff]  }
 0x34b   :  { %3061 = vmatpush3.bf16.msra.mxu1 %v3315_v55  ;;  %v3390_v55 = vld [vmem:[#allocation15 + $0x198] ss:$28 sps:$4 sm:$0xff]  }
 0x34c   :  { %3062 = vmatprep.subr.bf16.mxu1 %v3789_v8  ;;  %2492 = vmatpush1.bf16.msra.mxu0 %v3372_v48  ;;  %v3437_v48 = vld [vmem:[#allocation15 + $0x34c] ss:$28 sps:$4 sm:$0xff]  }
 0x34d   :  { %2493 = vmatprep.subr.bf16.mxu0 %v3380_v51  ;;  %v3438_v51 = vld [vmem:[#allocation15 + $0x358] ss:$28 sps:$4 sm:$0xff]  }
 0x34f   :  { %3063 = vmatpush3.bf16.msra.mxu1 %v3316_v56  ;;  %v3392_v56 = vld [vmem:[#allocation15 + $0x19c] ss:$28 sps:$4 sm:$0xff]  }
 0x350   :  { %3064 = vmatprep.subr.bf16.mxu1 %v3789_v8  ;;  %2494 = vmatpush1.bf16.msra.mxu0 %v3378_v50  ;;  %v3440_v50 = vld [vmem:[#allocation15 + $0x35c] ss:$28 sps:$4 sm:$0xff]  }
 0x351   :  { %2495 = vmatprep.subr.bf16.mxu0 %v3386_v54  ;;  %v1515_v54 = vld [vmem:[#allocation13] sm:$0x3] }
 0x353   :  { %3065 = vmatpush3.bf16.msra.mxu1 %v3317_v59  ;;  %v3402_v59 = vld [vmem:[#allocation15 + $0x208] ss:$28 sps:$4 sm:$0xff]  }
 0x354   :  { %3066 = vmatprep.subr.bf16.mxu1 %v3789_v8  ;;  %2496 = vmatpush1.bf16.msra.mxu0 %v3384_v52  ;;  %v3443_v52 = vld [vmem:[#allocation15 + $0xc] ss:$28 sps:$4 sm:$0xff]  }
 0x355   :  { %2497 = vmatprep.subr.bf16.mxu0 %v3392_v56  ;;  %v1524_v56 = vrot.slane %v1515_v54, %v4063_v13 }
 0x357   :  { %3067 = vmatpush3.bf16.msra.mxu1 %v3318_v63  ;;  %v3414_v63 = vld [vmem:[#allocation15 + $0x278] ss:$28 sps:$4 sm:$0xff]  }
 0x358   :  { %3068 = vmatprep.subr.bf16.mxu1 %v3789_v8  ;;  %2498 = vmatpush1.bf16.msra.mxu0 %v3390_v55  ;;  %v1520_v55 = vrot.slane %v1515_v54, %v4060_v11  ;;  %v3502_v54 = vld [vmem:[#allocation15 + $0x168] ss:$28 sps:$4 sm:$0xff]  }
 0x35b   :  { %3069 = vmatpush3.bf16.msra.mxu1 %v3319_v4  ;;  %v3428_v4 = vld [vmem:[#allocation15 + $0x2ec] ss:$28 sps:$4 sm:$0xff]  }
 0x35c   :  { %3070 = vmatprep.subr.bf16.mxu1 %v3789_v8  ;;  %v1372_v8 = vld [vmem:[%s4199_s1 + $0x8] sm:$0xff] }
 0x35f   :  { %3071 = vmatpush3.bf16.msra.mxu1 %v3320_v5  ;;  %v2823_v5 = vld [vmem:[#allocation10] ss:$0 sm:$0xff] }
 0x360   :  { %1607 = vmatprep.subr.bf16.mxu1 %v3323_v6 }
 0x415   :  { %v1356_v58 = vpop.f32.mrb[4].mxu1 }
 0x416   :  { %v1357_v60 = vadd.f32 %v2814_v57, %v1356_v58  ;;  %v3054_v61 = vpop.f32.mrb[5].mxu1  ;;  %v3398_v58 = vld [vmem:[#allocation15 + $0x1d4] ss:$28 sps:$4 sm:$0xff]  }
 0x417   :  { %v1359_v62 = vpop.f32.mrb[6].mxu1  ;;  %2499 = vmatprep.subr.bf16.mxu0 %v3398_v58  ;;  %v3408_v61 = vld [vmem:[#allocation15 + $0x240] ss:$28 sps:$4 sm:$0xff]  }
 0x418   :  { %v1363_v0 = vmax.f32 %v1357_v60, 0.0  ;;  %v1360_v1 = vadd.f32 %v2814_v57, %v1359_v62  ;;  %v3055_v2 = vpop.f32.mrb[7].mxu1  ;;  %v3396_v57 = vld [vmem:[#allocation15 + $0x1d0] ss:$28 sps:$4 sm:$0xff]   ;;  %v3410_v62 = vld [vmem:[#allocation15 + $0x244] ss:$28 sps:$4 sm:$0xff]  }
 0x419   :  { %2500 = vmatpush1.bf16.msra.mxu0 %v3396_v57  ;;  %v3404_v60 = vld [vmem:[#allocation15 + $0x20c] ss:$28 sps:$4 sm:$0xff]   ;;  %v3422_v2 = vld [vmem:[#allocation15 + $0x2b4] ss:$28 sps:$4 sm:$0xff]  }
 0x41a   :  { %1365 = vst [vmem:[%s4213_s15] sm:$0xff] %v1363_v0  ;;  %v1364_v3 = vmax.f32 %v1360_v1, 0.0  ;;  %1367 = vrot.lane.b32.xlu0 %v1363_v0, %s3791_s25  ;;  %2501 = vmatprep.subr.bf16.mxu0 %v3404_v60  ;;  %v3420_v1 = vld [vmem:[#allocation15 + $0x2b0] ss:$28 sps:$4 sm:$0xff]  }
 0x41c   :  { %1366 = vst [vmem:[%s4213_s15 + $0x8] sm:$0xff] %v1364_v3 }
 0x41d   :  { %2502 = vmatpush1.bf16.msra.mxu0 %v3402_v59 }
 0x41e   :  { %1369 = vrot.lane.b32.xlu0 %v1364_v3, %s3791_s25  ;;  %2503 = vmatprep.subr.bf16.mxu0 %v3410_v62 }
 0x421   :  { %2504 = vmatpush1.bf16.msra.mxu0 %v3408_v61 }
 0x48c   :  { %v1368_v7 = vpop.permute.xlu0 %1367 }
 0x48d   :  { %v1373_v9 = vmul.f32 0.5, %v1368_v7 }
 0x48f   :  { %v1375_v12 = vmul.f32 1.442695, %v1373_v9 }
 0x490   :  { %v1370_v14 = vpop.permute.xlu0 %1369 }
 0x491   :  { %3505 = vpow2.f32 %v1375_v12  ;;  %v1374_v15 = vmul.f32 0.5, %v1370_v14 }
 0x493   :  { %v1377_v16 = vmul.f32 1.442695, %v1374_v15 }
 0x495   :  { %3507 = vpow2.f32 %v1377_v16 }
 0x49b   :  { %v3506_v17 = vpop.eup %3505 }
 0x49c   :  { %v1379_v19 = vmul.f32 %v3506_v17, %v1371_v18  ;;  %v3345_v18 = vld [vmem:[#allocation15] ss:$28 sps:$4 sm:$0xff]  }
 0x49e   :  { %v1381_v22 = vadd.f32 %v1379_v19, %v1363_v0  ;;  %v3416_v0 = vld [vmem:[#allocation15 + $0x27c] ss:$28 sps:$4 sm:$0xff]  }
 0x49f   :  { %v3508_v20 = vpop.eup %3507  ;;  %2505 = vmatprep.subr.bf16.mxu0 %v3416_v0  ;;  %v3353_v19 = vld [vmem:[#allocation15 + $0x3c] ss:$28 sps:$4 sm:$0xff]  }
 0x4a0   :  { %v1380_v21 = vmul.f32 %v3508_v20, %v1372_v8  ;;  %2506 = vmatpush1.bf16.msra.mxu0 %v3414_v63  ;;  %v3351_v20 = vld [vmem:[#allocation15 + $0x38] ss:$28 sps:$4 sm:$0xff]  }
 0x4a1   :  { %2507 = vmatprep.subr.bf16.mxu0 %v3422_v2 }
 0x4a2   :  { %v1382_v23 = vadd.f32 %v1380_v21, %v1364_v3  ;;  %v3426_v3 = vld [vmem:[#allocation15 + $0x2e8] ss:$28 sps:$4 sm:$0xff]   ;;  %v3359_v21 = vld [vmem:[#allocation15 + $0x74] ss:$28 sps:$4 sm:$0xff]  }
 0x4a4   :  { %v1383_v25 = vpack.c.bf16 %v1382_v23, %v1381_v22  ;;  %2508 = vmatpush1.bf16.msra.mxu0 %v3420_v1  ;;  %v3357_v22 = vld [vmem:[#allocation15 + $0x70] ss:$28 sps:$4 sm:$0xff]  }
 0x4a5   :  { %2509 = vmatprep.subr.bf16.mxu0 %v3428_v4  ;;  %v3365_v23 = vld [vmem:[#allocation15 + $0xac] ss:$28 sps:$4 sm:$0xff]  }
 0x4a6   :  { %3073 = vmatmul.mubr.bf16.vlgmr.msra.gmra.mrb[8].mxu1 %v1383_v25  ;;  %v3371_v25 = vld [vmem:[#allocation15 + $0xe4] ss:$28 sps:$4 sm:$0xff]  }
 0x4a7   :  { %1608 = vmatpush1.bf16.msra.mxu1 %v3321_v24  ;;  %1639 = vmatprep.mubr.bf16.mxu1 %v3788_v53  ;;  %v3339_v53 = vld [vmem:[#allocation12 + $0x60] ss:$8 sps:$4 sm:$0xff]  }
 0x4a8   :  { %1609 = vmatprep.subr.bf16.mxu1 %v3326_v26  ;;  %2510 = vmatpush1.bf16.msra.mxu0 %v3426_v3  ;;  %v3363_v24 = vld [vmem:[#allocation15 + $0xa8] ss:$28 sps:$4 sm:$0xff]   ;;  %v3369_v26 = vld [vmem:[#allocation15 + $0xe0] ss:$28 sps:$4 sm:$0xff]  }
 0x4a9   :  { %2511 = vmatprep.subr.bf16.mxu0 %v3434_v46  ;;  %v3495_v46 = vld [vmem:[#allocation15 + $0x280] ss:$28 sps:$4 sm:$0xff]  }
 0x4ab   :  { %1610 = vmatpush1.bf16.msra.mxu1 %v3324_v27  ;;  %v3377_v27 = vld [vmem:[#allocation15 + $0x11c] ss:$28 sps:$4 sm:$0xff]  }
 0x4ac   :  { %1611 = vmatprep.subr.bf16.mxu1 %v3329_v28  ;;  %v3375_v28 = vld [vmem:[#allocation15 + $0x118] ss:$28 sps:$4 sm:$0xff]   ;;  %2512 = vmatpush1.bf16.msra.mxu0 %v3432_v47  ;;  %v3496_v47 = vld [vmem:[#allocation15 + $0xc0] ss:$28 sps:$4 sm:$0xff]  }
 0x4ad   :  { %2513 = vmatprep.subr.bf16.mxu0 %v3440_v50  ;;  %v3499_v50 = vld [vmem:[#allocation15 + $0x2f0] ss:$28 sps:$4 sm:$0xff]  }
 0x4af   :  { %1612 = vmatpush1.bf16.msra.mxu1 %v3327_v29  ;;  %v3383_v29 = vld [vmem:[#allocation15 + $0x154] ss:$28 sps:$4 sm:$0xff]  }
 0x4b0   :  { %1613 = vmatprep.subr.bf16.mxu1 %v3332_v30  ;;  %v3381_v30 = vld [vmem:[#allocation15 + $0x150] ss:$28 sps:$4 sm:$0xff]   ;;  %2514 = vmatpush1.bf16.msra.mxu0 %v3438_v51 }
 0x4b1   :  { %v3500_v51 = vld [vmem:[#allocation15 + $0x130] ss:$28 sps:$4 sm:$0xff]  }
 0x4b3   :  { %1614 = vmatpush1.bf16.msra.mxu1 %v3330_v31  ;;  %v3389_v31 = vld [vmem:[#allocation15 + $0x18c] ss:$28 sps:$4 sm:$0xff]  }
 0x4b4   :  { %1615 = vmatprep.subr.bf16.mxu1 %v3335_v32  ;;  %v3387_v32 = vld [vmem:[#allocation15 + $0x188] ss:$28 sps:$4 sm:$0xff]  }
 0x4b7   :  { %1616 = vmatpush1.bf16.msra.mxu1 %v3333_v33  ;;  %v3395_v33 = vld [vmem:[#allocation15 + $0x1c4] ss:$28 sps:$4 sm:$0xff]  }
 0x4b8   :  { %1617 = vmatprep.subr.bf16.mxu1 %v3338_v34  ;;  %v3393_v34 = vld [vmem:[#allocation15 + $0x1c0] ss:$28 sps:$4 sm:$0xff]  }
 0x4bb   :  { %1618 = vmatpush1.bf16.msra.mxu1 %v3336_v35  ;;  %v3401_v35 = vld [vmem:[#allocation15 + $0x1fc] ss:$28 sps:$4 sm:$0xff]  }
 0x4bc   :  { %1619 = vmatprep.subr.bf16.mxu1 %v3341_v36  ;;  %v3399_v36 = vld [vmem:[#allocation15 + $0x1f8] ss:$28 sps:$4 sm:$0xff]  }
 0x4bf   :  { %1620 = vmatpush1.bf16.msra.mxu1 %v3339_v53  ;;  %v3407_v53 = vld [vmem:[#allocation15 + $0x234] ss:$28 sps:$4 sm:$0xff]  }
 0x4c0   :  { %1621 = vmatprep.subr.bf16.mxu1 %v3344_v37  ;;  %v3405_v37 = vld [vmem:[#allocation15 + $0x230] ss:$28 sps:$4 sm:$0xff]  }
 0x4c3   :  { %1622 = vmatpush1.bf16.msra.mxu1 %v3342_v38  ;;  %v3413_v38 = vld [vmem:[#allocation15 + $0x26c] ss:$28 sps:$4 sm:$0xff]  }
 0x4c4   :  { %2397 = vmatprep.subr.bf16.mxu1 %v3347_v39  ;;  %v3411_v39 = vld [vmem:[#allocation15 + $0x268] ss:$28 sps:$4 sm:$0xff]  }
 0x579   :  { %v1489_v6 = vpop.f32.mrb[8].mxu1 }
 0x57a   :  { %v1490_v7 = vadd.f32 %v2823_v5, %v1489_v6  ;;  %v3074_v9 = vpop.f32.mrb[9].mxu1 }
 0x57b   :  { %v1492_v12 = vpop.f32.mrb[10].mxu1  ;;  %v3446_v9 = vld [vmem:[#allocation15 + $0x44] ss:$28 sps:$4 sm:$0xff]  }
 0x57c   :  { %v1493_v14 = vadd.f32 %v2823_v5, %v1492_v12  ;;  %v3075_v15 = vpop.f32.mrb[11].mxu1  ;;  %v1496_v16 = vmax.f32 %v1490_v7, 0.0  ;;  %v3441_v7 = vld [vmem:[#allocation15 + $0x8] ss:$28 sps:$4 sm:$0xff]   ;;  %v3444_v12 = vld [vmem:[#allocation15 + $0x40] ss:$28 sps:$4 sm:$0xff]  }
 0x57d   :  { %v3447_v15 = vld [vmem:[#allocation15 + $0x78] ss:$28 sps:$4 sm:$0xff]  }
 0x57e   :  { %v1497_v17 = vmax.f32 %v1493_v14, 0.0  ;;  %v3449_v14 = vld [vmem:[#allocation15 + $0x7c] ss:$28 sps:$4 sm:$0xff]  }
 0x580   :  { %v1498_v8 = vpack.c.bf16 %v1497_v17, %v1496_v16  ;;  %v3452_v16 = vld [vmem:[#allocation15 + $0xb4] ss:$28 sps:$4 sm:$0xff]  }
 0x581   :  { %v3450_v17 = vld [vmem:[#allocation15 + $0xb0] ss:$28 sps:$4 sm:$0xff]  }
 0x582   :  { %1640 = vmatmul.mubr.bf16.vlgmr.msra.gmra.mrb[12].mxu1 %v1498_v8  ;;  %v3453_v8 = vld [vmem:[#allocation15 + $0xe8] ss:$28 sps:$4 sm:$0xff]  }
 0x583   :  { %2398 = vmatpush1.bf16.msra.mxu1 %v3345_v18  ;;  %v3455_v18 = vld [vmem:[#allocation15 + $0xec] ss:$28 sps:$4 sm:$0xff]  }
 0x584   :  { %2399 = vmatprep.subr.bf16.mxu1 %v3353_v19  ;;  %v3458_v19 = vld [vmem:[#allocation15 + $0x124] ss:$28 sps:$4 sm:$0xff]  }
 0x587   :  { %2400 = vmatpush1.bf16.msra.mxu1 %v3351_v20  ;;  %v3456_v20 = vld [vmem:[#allocation15 + $0x120] ss:$28 sps:$4 sm:$0xff]  }
 0x588   :  { %2401 = vmatprep.subr.bf16.mxu1 %v3359_v21  ;;  %v3461_v21 = vld [vmem:[#allocation15 + $0x15c] ss:$28 sps:$4 sm:$0xff]  }
 0x58b   :  { %2402 = vmatpush1.bf16.msra.mxu1 %v3357_v22  ;;  %v3459_v22 = vld [vmem:[#allocation15 + $0x158] ss:$28 sps:$4 sm:$0xff]  }
 0x58c   :  { %2403 = vmatprep.subr.bf16.mxu1 %v3365_v23  ;;  %v3464_v23 = vld [vmem:[#allocation15 + $0x194] ss:$28 sps:$4 sm:$0xff]  }
 0x58f   :  { %2404 = vmatpush1.bf16.msra.mxu1 %v3363_v24  ;;  %v3462_v24 = vld [vmem:[#allocation15 + $0x190] ss:$28 sps:$4 sm:$0xff]  }
 0x590   :  { %2405 = vmatprep.subr.bf16.mxu1 %v3371_v25  ;;  %v3467_v25 = vld [vmem:[#allocation15 + $0x1cc] ss:$28 sps:$4 sm:$0xff]  }
 0x593   :  { %2406 = vmatpush1.bf16.msra.mxu1 %v3369_v26  ;;  %v3465_v26 = vld [vmem:[#allocation15 + $0x1c8] ss:$28 sps:$4 sm:$0xff]  }
 0x594   :  { %2407 = vmatprep.subr.bf16.mxu1 %v3377_v27  ;;  %v3470_v27 = vld [vmem:[#allocation15 + $0x204] ss:$28 sps:$4 sm:$0xff]  }
 0x597   :  { %2408 = vmatpush1.bf16.msra.mxu1 %v3375_v28  ;;  %v3468_v28 = vld [vmem:[#allocation15 + $0x200] ss:$28 sps:$4 sm:$0xff]  }
 0x598   :  { %2409 = vmatprep.subr.bf16.mxu1 %v3383_v29  ;;  %v3473_v29 = vld [vmem:[#allocation15 + $0x23c] ss:$28 sps:$4 sm:$0xff]  }
 0x59b   :  { %2410 = vmatpush1.bf16.msra.mxu1 %v3381_v30  ;;  %v3471_v30 = vld [vmem:[#allocation15 + $0x238] ss:$28 sps:$4 sm:$0xff]  }
 0x59c   :  { %2411 = vmatprep.subr.bf16.mxu1 %v3389_v31  ;;  %v3476_v31 = vld [vmem:[#allocation15 + $0x274] ss:$28 sps:$4 sm:$0xff]  }
 0x59f   :  { %2412 = vmatpush1.bf16.msra.mxu1 %v3387_v32  ;;  %v3474_v32 = vld [vmem:[#allocation15 + $0x270] ss:$28 sps:$4 sm:$0xff]  }
 0x5a0   :  { %2413 = vmatprep.subr.bf16.mxu1 %v3395_v33  ;;  %v3479_v33 = vld [vmem:[#allocation15 + $0x2ac] ss:$28 sps:$4 sm:$0xff]  }
 0x5a3   :  { %2414 = vmatpush1.bf16.msra.mxu1 %v3393_v34  ;;  %v3477_v34 = vld [vmem:[#allocation15 + $0x2a8] ss:$28 sps:$4 sm:$0xff]  }
 0x5a4   :  { %2415 = vmatprep.subr.bf16.mxu1 %v3401_v35  ;;  %v3482_v35 = vld [vmem:[#allocation15 + $0x2e4] ss:$28 sps:$4 sm:$0xff]  }
 0x5a7   :  { %2416 = vmatpush1.bf16.msra.mxu1 %v3399_v36  ;;  %v3480_v36 = vld [vmem:[#allocation15 + $0x2e0] ss:$28 sps:$4 sm:$0xff]  }
 0x5a8   :  { %2417 = vmatprep.subr.bf16.mxu1 %v3407_v53  ;;  %v3485_v53 = vld [vmem:[#allocation15 + $0x31c] ss:$28 sps:$4 sm:$0xff]  }
 0x5ab   :  { %2418 = vmatpush1.bf16.msra.mxu1 %v3405_v37  ;;  %v3483_v37 = vld [vmem:[#allocation15 + $0x318] ss:$28 sps:$4 sm:$0xff]  }
 0x5ac   :  { %2419 = vmatprep.subr.bf16.mxu1 %v3413_v38  ;;  %v3488_v38 = vld [vmem:[#allocation15 + $0x354] ss:$28 sps:$4 sm:$0xff]  }
 0x5af   :  { %2420 = vmatpush1.bf16.msra.mxu1 %v3411_v39  ;;  %v3486_v39 = vld [vmem:[#allocation15 + $0x350] ss:$28 sps:$4 sm:$0xff]  }
 0x5b0   :  { %2421 = vmatprep.subr.bf16.mxu1 %v3419_v40  ;;  %v3489_v40 = vld [vmem:[#allocation15 + $0x1d8] ss:$28 sps:$4 sm:$0xff]  }
 0x5b3   :  { %2422 = vmatpush1.bf16.msra.mxu1 %v3417_v41  ;;  %v3490_v41 = vld [vmem:[#allocation15 + $0x18] ss:$28 sps:$4 sm:$0xff]  }
 0x5b4   :  { %2423 = vmatprep.subr.bf16.mxu1 %v3425_v42  ;;  %v3491_v42 = vld [vmem:[#allocation15 + $0x210] ss:$28 sps:$4 sm:$0xff]  }
 0x5b7   :  { %2424 = vmatpush1.bf16.msra.mxu1 %v3423_v43  ;;  %v3492_v43 = vld [vmem:[#allocation15 + $0x50] ss:$28 sps:$4 sm:$0xff]  }
 0x5b8   :  { %2425 = vmatprep.subr.bf16.mxu1 %v3431_v44  ;;  %v3493_v44 = vld [vmem:[#allocation15 + $0x248] ss:$28 sps:$4 sm:$0xff]  }
 0x5bb   :  { %2426 = vmatpush1.bf16.msra.mxu1 %v3429_v45  ;;  %v3494_v45 = vld [vmem:[#allocation15 + $0x88] ss:$28 sps:$4 sm:$0xff]  }
 0x5bc   :  { %2427 = vmatprep.subr.bf16.mxu1 %v3437_v48  ;;  %v3497_v48 = vld [vmem:[#allocation15 + $0x2b8] ss:$28 sps:$4 sm:$0xff]  }
 0x5bf   :  { %2428 = vmatpush1.bf16.msra.mxu1 %v3435_v49  ;;  %v3498_v49 = vld [vmem:[#allocation15 + $0xf8] ss:$28 sps:$4 sm:$0xff]  }
 0x5c0   :  { %2440 = vmatprep.subr.bf16.mxu1 %v3443_v52  ;;  %v3501_v52 = vld [vmem:[#allocation15 + $0x328] ss:$28 sps:$4 sm:$0xff]  }
 0x655   :  { %v1641_v57 = vpop.f32.mrb[12].mxu1 }
 0x656   :  { %v1642_v58 = vadd.f32 %v1641_v57, %v1520_v55  ;;  %v1643_v59 = vpop.f32.mrb[13].mxu1  ;;  %v1804_v57 = vsub.s32 4, %v4057_v10 }
 0x657   :  { %v1644_v60 = vadd.f32 %v1643_v59, %v1524_v56  ;;  %v1645_v61 = vpop.f32.mrb[14].mxu1  ;;  %v1808_v59 = vsub.s32 5, %v4057_v10 }
 0x658   :  { %v1646_v62 = vadd.f32 %v1645_v61, %v1520_v55  ;;  %v1647_v63 = vpop.f32.mrb[15].mxu1  ;;  %v1650_v1 = vmax.f32 %v1642_v58, 0.0  ;;  %v3503_v55 = vld [vmem:[#allocation15 + $0x360] ss:$28 sps:$4 sm:$0xff]  }
 0x659   :  { %v1648_v0 = vadd.f32 %v1647_v63, %v1524_v56  ;;  %v1651_v3 = vmax.f32 %v1644_v60, 0.0  ;;  %v3504_v56 = vld [vmem:[#allocation15 + $0x1a0] ss:$28 sps:$4 sm:$0xff]  }
 0x65a   :  { %v1652_v2 = vmax.f32 %v1646_v62, 0.0  ;;  %v4141_v58 = vld [vmem:[%s4211_s13] sm:$0xff] }
 0x65b   :  { %v1653_v4 = vmax.f32 %v1648_v0, 0.0  ;;  %v1789_v60 = vrot.slane %v4141_v58, %v4060_v11  ;;  %v1805_v61 = vrot.slane %v4141_v58, %v1804_v57  ;;  %v1793_v62 = vrot.slane %v4141_v58, %v4063_v13 }
 0x65c   :  { %v4125_v5 = vpack.c.bf16 %v1652_v2, %v1650_v1  ;;  %v1809_v63 = vrot.slane %v4141_v58, %v1808_v59 }
 0x65d   :  { %v4127_v6 = vpack.c.bf16 %v1653_v4, %v1651_v3 }
 0x65f   :  { %2429 = vmatprep.mubr.bf16.mxu1 %v4127_v6  ;;  %2515 = vmatprep.mubr.bf16.mxu0 %v4127_v6 }
 0x660   :  { %2430 = vmatmul.mubr.bf16.vlgmr.msra.gmra.mrb[16].mxu1 %v4125_v5  ;;  %2516 = vmatmul.mubr.bf16.vlgmr.msra.gmra.mrb[4].mxu0 %v4125_v5 }
 0x661   :  { %2441 = vmatpush1.bf16.msra.mxu1 %v3441_v7  ;;  %2472 = vmatprep.mubr.bf16.mxu1 %v4127_v6 }
 0x662   :  { %2442 = vmatprep.subr.bf16.mxu1 %v3446_v9 }
 0x665   :  { %2443 = vmatpush1.bf16.msra.mxu1 %v3444_v12 }
 0x666   :  { %2444 = vmatprep.subr.bf16.mxu1 %v3449_v14 }
 0x669   :  { %2445 = vmatpush1.bf16.msra.mxu1 %v3447_v15 }
 0x66a   :  { %2446 = vmatprep.subr.bf16.mxu1 %v3452_v16 }
 0x66d   :  { %2447 = vmatpush1.bf16.msra.mxu1 %v3450_v17 }
 0x66e   :  { %2448 = vmatprep.subr.bf16.mxu1 %v3455_v18 }
 0x671   :  { %2449 = vmatpush1.bf16.msra.mxu1 %v3453_v8 }
 0x672   :  { %2450 = vmatprep.subr.bf16.mxu1 %v3458_v19 }
 0x675   :  { %2451 = vmatpush1.bf16.msra.mxu1 %v3456_v20 }
 0x676   :  { %2452 = vmatprep.subr.bf16.mxu1 %v3461_v21 }
 0x679   :  { %2453 = vmatpush1.bf16.msra.mxu1 %v3459_v22 }
 0x67a   :  { %2454 = vmatprep.subr.bf16.mxu1 %v3464_v23 }
 0x67d   :  { %2455 = vmatpush1.bf16.msra.mxu1 %v3462_v24 }
 0x67e   :  { %2456 = vmatprep.subr.bf16.mxu1 %v3467_v25 }
 0x681   :  { %2457 = vmatpush1.bf16.msra.mxu1 %v3465_v26 }
 0x682   :  { %2458 = vmatprep.subr.bf16.mxu1 %v3470_v27 }
 0x685   :  { %2459 = vmatpush1.bf16.msra.mxu1 %v3468_v28 }
 0x686   :  { %2460 = vmatprep.subr.bf16.mxu1 %v3473_v29 }
 0x689   :  { %2461 = vmatpush1.bf16.msra.mxu1 %v3471_v30 }
 0x68a   :  { %2462 = vmatprep.subr.bf16.mxu1 %v3476_v31 }
 0x68d   :  { %2463 = vmatpush1.bf16.msra.mxu1 %v3474_v32 }
 0x68e   :  { %2464 = vmatprep.subr.bf16.mxu1 %v3479_v33 }
 0x691   :  { %2465 = vmatpush1.bf16.msra.mxu1 %v3477_v34 }
 0x692   :  { %2466 = vmatprep.subr.bf16.mxu1 %v3482_v35 }
 0x695   :  { %2467 = vmatpush1.bf16.msra.mxu1 %v3480_v36 }
 0x696   :  { %2468 = vmatprep.subr.bf16.mxu1 %v3485_v53 }
 0x699   :  { %2469 = vmatpush1.bf16.msra.mxu1 %v3483_v37 }
 0x69a   :  { %2470 = vmatprep.subr.bf16.mxu1 %v3488_v38 }
 0x69d   :  { %2471 = vmatpush1.bf16.msra.mxu1 %v3486_v39 }
 0x69e   :  { %3014 = vmatprep.subr.bf16.mxu1 %v3489_v40 }
 0x6a0   :  { %2473 = vmatmul.mubr.bf16.vlgmr.msra.gmra.mrb[20].mxu1 %v4125_v5 }
 0x6a1   :  { %3015 = vmatpush3.bf16.msra.mxu1 %v3490_v41  ;;  %2558 = vmatprep.mubr.bf16.mxu1 %v4127_v6 }
 0x6a2   :  { %3016 = vmatprep.subr.bf16.mxu1 %v3491_v42 }
 0x6a5   :  { %3017 = vmatpush3.bf16.msra.mxu1 %v3492_v43 }
 0x6a6   :  { %3018 = vmatprep.subr.bf16.mxu1 %v3493_v44 }
 0x6a9   :  { %3019 = vmatpush3.bf16.msra.mxu1 %v3494_v45 }
 0x6aa   :  { %3020 = vmatprep.subr.bf16.mxu1 %v3495_v46 }
 0x6ad   :  { %3021 = vmatpush3.bf16.msra.mxu1 %v3496_v47 }
 0x6ae   :  { %3022 = vmatprep.subr.bf16.mxu1 %v3497_v48  ;;  %v1796_v48 = vsub.s32 2, %v4057_v10 }
 0x6b1   :  { %3023 = vmatpush3.bf16.msra.mxu1 %v3498_v49  ;;  %v1800_v49 = vsub.s32 3, %v4057_v10 }
 0x6b2   :  { %3024 = vmatprep.subr.bf16.mxu1 %v3499_v50  ;;  %v1797_v50 = vrot.slane %v4141_v58, %v1796_v48 }
 0x6b5   :  { %3025 = vmatpush3.bf16.msra.mxu1 %v3500_v51  ;;  %v1801_v51 = vrot.slane %v4141_v58, %v1800_v49 }
 0x6b6   :  { %3026 = vmatprep.subr.bf16.mxu1 %v3501_v52 }
 0x6b9   :  { %3027 = vmatpush3.bf16.msra.mxu1 %v3502_v54 }
 0x6ba   :  { %3028 = vmatprep.subr.bf16.mxu1 %v3503_v55 }
 0x6bd   :  { %3029 = vmatpush3.bf16.msra.mxu1 %v3504_v56 }
 0x6c0   :  { %2559 = vmatmul.mubr.bf16.vlgmr.msra.gmra.mrb[24].mxu1 %v4125_v5 }
 0x733   :  { %v2431_v0 = vpop.f32.mrb[16].mxu1  ;;  %v2517_v1 = vpop.f32.mrb[4].mxu0 }
 0x734   :  { %v2432_v2 = vadd.f32 %v2431_v0, %v1789_v60  ;;  %v2518_v3 = vadd.f32 %v2517_v1, %v1805_v61  ;;  %v2433_v4 = vpop.f32.mrb[17].mxu1  ;;  %v2519_v5 = vpop.f32.mrb[5].mxu0 }
 0x735   :  { %v2434_v6 = vadd.f32 %v2433_v4, %v1793_v62  ;;  %v2520_v7 = vadd.f32 %v2519_v5, %v1809_v63  ;;  %v2435_v9 = vpop.f32.mrb[18].mxu1  ;;  %v2521_v12 = vpop.f32.mrb[6].mxu0 }
 0x736   :  { %v2960_v14 = vmul.f32 -1.442695, %v2432_v2  ;;  %v2964_v15 = vmul.f32 -1.442695, %v2518_v3  ;;  %v2436_v11 = vadd.f32 %v2435_v9, %v1789_v60  ;;  %v2522_v16 = vadd.f32 %v2521_v12, %v1805_v61  ;;  %v2437_v17 = vpop.f32.mrb[19].mxu1  ;;  %v2523_v18 = vpop.f32.mrb[7].mxu0 }
 0x737   :  { %v2961_v8 = vmul.f32 -1.442695, %v2434_v6  ;;  %v2965_v13 = vmul.f32 -1.442695, %v2520_v7  ;;  %v2438_v19 = vadd.f32 %v2437_v17, %v1793_v62  ;;  %v2524_v20 = vadd.f32 %v2523_v18, %v1809_v63 }
 0x738   :  { %3509 = vpow2.f32 %v2960_v14  ;;  %v2967_v21 = vmul.f32 -1.442695, %v2436_v11  ;;  %v2971_v22 = vmul.f32 -1.442695, %v2522_v16 }
 0x739   :  { %3511 = vpow2.f32 %v2964_v15  ;;  %v2968_v23 = vmul.f32 -1.442695, %v2438_v19  ;;  %v2972_v24 = vmul.f32 -1.442695, %v2524_v20  ;;  %v1812_v15 = vsub.s32 6, %v4057_v10 }
 0x73a   :  { %3513 = vpow2.f32 %v2961_v8 }
 0x73b   :  { %3515 = vpow2.f32 %v2965_v13  ;;  %v1813_v18 = vrot.slane %v4141_v58, %v1812_v15 }
 0x73c   :  { %3517 = vpow2.f32 %v2967_v21 }
 0x73d   :  { %3519 = vpow2.f32 %v2971_v22 }
 0x73e   :  { %3521 = vpow2.f32 %v2968_v23 }
 0x73f   :  { %3523 = vpow2.f32 %v2972_v24 }
 0x742   :  { %v3510_v25 = vpop.eup %3509 }
 0x743   :  { %v3512_v26 = vpop.eup %3511  ;;  %v2609_v27 = vadd.f32 1.0, %v3510_v25 }
 0x744   :  { %v3514_v28 = vpop.eup %3513  ;;  %v2613_v29 = vadd.f32 1.0, %v3512_v26 }
 0x745   :  { %v3516_v30 = vpop.eup %3515  ;;  %3525 = vrcp.f32 %v2609_v27  ;;  %v2610_v31 = vadd.f32 1.0, %v3514_v28 }
 0x746   :  { %v3518_v32 = vpop.eup %3517  ;;  %3527 = vrcp.f32 %v2613_v29  ;;  %v2614_v33 = vadd.f32 1.0, %v3516_v30 }
 0x747   :  { %v3520_v34 = vpop.eup %3519  ;;  %3529 = vrcp.f32 %v2610_v31  ;;  %v2616_v35 = vadd.f32 1.0, %v3518_v32 }
 0x748   :  { %v3522_v36 = vpop.eup %3521  ;;  %3531 = vrcp.f32 %v2614_v33  ;;  %v2620_v53 = vadd.f32 1.0, %v3520_v34 }
 0x749   :  { %v3524_v37 = vpop.eup %3523  ;;  %3533 = vrcp.f32 %v2616_v35  ;;  %v2617_v38 = vadd.f32 1.0, %v3522_v36 }
 0x74a   :  { %3535 = vrcp.f32 %v2620_v53  ;;  %v2621_v39 = vadd.f32 1.0, %v3524_v37 }
 0x74b   :  { %3537 = vrcp.f32 %v2617_v38 }
 0x74c   :  { %3539 = vrcp.f32 %v2621_v39 }
 0x74f   :  { %v3526_v40 = vpop.eup %3525 }
 0x750   :  { %v3528_v41 = vpop.eup %3527  ;;  %2651 = vst [vmem:[%s4212_s14] sm:$0xff] %v3526_v40 }
 0x751   :  { %v3530_v42 = vpop.eup %3529  ;;  %2655 = vst [vmem:[%s4212_s14 + $0x20] sm:$0xff] %v3528_v41 }
 0x752   :  { %v3532_v43 = vpop.eup %3531  ;;  %2652 = vst [vmem:[%s4212_s14 + $0x8] sm:$0xff] %v3530_v42 }
 0x753   :  { %v3534_v44 = vpop.eup %3533  ;;  %2656 = vst [vmem:[%s4212_s14 + $0x28] sm:$0xff] %v3532_v43 }
 0x754   :  { %v3536_v45 = vpop.eup %3535  ;;  %2658 = vst [vmem:[%s4212_s14 + $0x38] sm:$0xff] %v3534_v44 }
 0x755   :  { %v3538_v46 = vpop.eup %3537  ;;  %2662 = vst [vmem:[%s4212_s14 + $0x58] sm:$0xff] %v3536_v45 }
 0x756   :  { %v3540_v47 = vpop.eup %3539  ;;  %2659 = vst [vmem:[%s4212_s14 + $0x40] sm:$0xff] %v3538_v46 }
 0x757   :  { %2663 = vst [vmem:[%s4212_s14 + $0x60] sm:$0xff] %v3540_v47 }
 0x773   :  { %v2474_v52 = vpop.f32.mrb[20].mxu1 }
 0x774   :  { %v2475_v54 = vadd.f32 %v2474_v52, %v1797_v50  ;;  %v2476_v55 = vpop.f32.mrb[21].mxu1 }
 0x775   :  { %v2477_v56 = vadd.f32 %v2476_v55, %v1801_v51  ;;  %v2478_v57 = vpop.f32.mrb[22].mxu1 }
 0x776   :  { %v2962_v59 = vmul.f32 -1.442695, %v2475_v54  ;;  %v2479_v60 = vadd.f32 %v2478_v57, %v1797_v50  ;;  %v2480_v61 = vpop.f32.mrb[23].mxu1 }
 0x777   :  { %v2963_v62 = vmul.f32 -1.442695, %v2477_v56  ;;  %v2481_v63 = vadd.f32 %v2480_v61, %v1801_v51 }
 0x778   :  { %3541 = vpow2.f32 %v2962_v59  ;;  %v2969_v0 = vmul.f32 -1.442695, %v2479_v60 }
 0x779   :  { %3543 = vpow2.f32 %v2963_v62  ;;  %v2970_v1 = vmul.f32 -1.442695, %v2481_v63 }
 0x77a   :  { %3545 = vpow2.f32 %v2969_v0 }
 0x77b   :  { %3547 = vpow2.f32 %v2970_v1 }
 0x782   :  { %v3542_v2 = vpop.eup %3541 }
 0x783   :  { %v3544_v3 = vpop.eup %3543  ;;  %v2611_v4 = vadd.f32 1.0, %v3542_v2 }
 0x784   :  { %v3546_v5 = vpop.eup %3545  ;;  %v2612_v6 = vadd.f32 1.0, %v3544_v3 }
 0x785   :  { %v3548_v7 = vpop.eup %3547  ;;  %3549 = vrcp.f32 %v2611_v4  ;;  %v2618_v9 = vadd.f32 1.0, %v3546_v5 }
 0x786   :  { %3551 = vrcp.f32 %v2612_v6  ;;  %v2619_v12 = vadd.f32 1.0, %v3548_v7 }
 0x787   :  { %3553 = vrcp.f32 %v2618_v9 }
 0x788   :  { %3555 = vrcp.f32 %v2619_v12 }
 0x78f   :  { %v3550_v14 = vpop.eup %3549 }
 0x790   :  { %v3552_v11 = vpop.eup %3551  ;;  %2653 = vst [vmem:[%s4212_s14 + $0x10] sm:$0xff] %v3550_v14 }
 0x791   :  { %v3554_v16 = vpop.eup %3553  ;;  %2654 = vst [vmem:[%s4212_s14 + $0x18] sm:$0xff] %v3552_v11 }
 0x792   :  { %v3556_v17 = vpop.eup %3555  ;;  %2660 = vst [vmem:[%s4212_s14 + $0x48] sm:$0xff] %v3554_v16 }
 0x793   :  { %2661 = vst [vmem:[%s4212_s14 + $0x50] sm:$0xff] %v3556_v17  ;;  %v3030_v10 = vpop.f32.mrb[24].mxu1 }
 0x794   :  { %v3031_v8 = vpop.f32.mrb[25].mxu1 }
 0x795   :  { %v3032_v13 = vadd.f32 %v3031_v8, %v3030_v10  ;;  %v3033_v19 = vpop.f32.mrb[26].mxu1 }
 0x796   :  { %v3034_v20 = vpop.f32.mrb[27].mxu1 }
 0x797   :  { %v2561_v21 = vadd.f32 %v3032_v13, %v1813_v18  ;;  %v3035_v22 = vadd.f32 %v3034_v20, %v3033_v19 }
 0x799   :  { %v2966_v23 = vmul.f32 -1.442695, %v2561_v21  ;;  %v2564_v24 = vadd.f32 %v3035_v22, %v1813_v18 }
 0x79b   :  { %3557 = vpow2.f32 %v2966_v23  ;;  %v2973_v25 = vmul.f32 -1.442695, %v2564_v24 }
 0x79d   :  { %3559 = vpow2.f32 %v2973_v25 }
 0x7a5   :  { %v3558_v26 = vpop.eup %3557 }
 0x7a6   :  { %v2615_v27 = vadd.f32 1.0, %v3558_v26 }
 0x7a7   :  { %v3560_v28 = vpop.eup %3559 }
 0x7a8   :  { %3561 = vrcp.f32 %v2615_v27  ;;  %v2622_v29 = vadd.f32 1.0, %v3560_v28 }
 0x7aa   :  { %3563 = vrcp.f32 %v2622_v29 }
 0x7b2   :  { %v3562_v30 = vpop.eup %3561 }
 0x7b3   :  { %2657 = vst [vmem:[%s4212_s14 + $0x30] sm:$0xff] %v3562_v30 }
 0x7b4   :  { %v3564_v58 = vpop.eup %3563 }
 0x7b5   :  { %2664 = vst [vmem:[%s4212_s14 + $0x68] sm:$0xff] %v3564_v58 }
 0x7b6   :  { %2673 = vsyncpa [#allocation3], 1 }
 0x7b7   :  { %2674 = vsyncpa [#allocation5], 1 }
 0x7b8   :  { %2675 = vsyncpa [#allocation8], 1 }
 0x7b9   :  { %2676 = vsyncpa [#allocation11], 1 }
 0x7ba   :  { %2677 = vsyncpa [#allocation14], 1 }

</bundles_post_ra>
